<compile_context>
chip_gen: v7x
topology: tpu7x:2x2x1
jax: 0.10.0
libtpu: 0.0.40
codegen_flags: <defaults>
</compile_context>

<pallas_src>
import functools

import jax
import jax.numpy as jnp
from jax.experimental import pallas as pl
from jax.experimental.pallas import tpu as pltpu


def _round_up(x, m):
    return (x + m - 1) // m * m


def _tpu_tuning():
    """Per-generation pixel-block / VMEM targets.  Unknown chips get v7x-safe defaults
    (64 MiB physical VMEM per TensorCore); v5e/v6e (128 MiB VMEM) get bigger blocks."""
    try:
        kind = jax.devices()[0].device_kind.lower()
    except Exception:  # defensive: never fail just because the query is unavailable
        kind = ""
    if ("v5" in kind) or ("v6" in kind):
        return dict(block_pixels=4096, vmem_budget=64 << 20, vmem_limit=96 << 20)
    return dict(block_pixels=3072, vmem_budget=28 << 20, vmem_limit=48 << 20)


def _trilinear_kernel(bcol_ref, gcol_ref, rcol_ref, lut_ref, x_ref, o_ref, *, inv_bin):
    """One (batch, pixel-block) grid step.

    bcol_ref: (Db, 1) f32   blue-axis LUT grid indices (Db == dim)
    gcol_ref: (Dg, 1) f32   green-axis indices, padded rows hold -2 (weight 0)
    rcol_ref: (Di, 1) f32   red-axis indices (Di = round_up(dim, 8))
    lut_ref : (3*Di, Db*Dg) bf16   rows = (out channel, r), cols = (b major, g minor)
    x_ref / o_ref: (1, 3, P)   pixel block, channels on sublanes, P pixels on lanes.
    """
    db = bcol_ref.shape[0]
    dg = gcol_ref.shape[0]
    di = rcol_ref.shape[0]
    p = x_ref.shape[2]

    x = x_ref[0].astype(jnp.float32)            # (3, P)
    t = x * jnp.float32(inv_bin)                # coordinates in LUT-grid units
    tr = t[0:1, :]                              # red   -> fastest LUT axis
    tg = t[1:2, :]                              # green -> middle LUT axis
    tb = t[2:3, :]                              # blue  -> slowest LUT axis

    # Per-axis two-hot "tent" weights hat(u) = max(0, 1-|u|), built only at O(dim * P) cost.
    wb = jnp.maximum(0.0, 1.0 - jnp.abs(bcol_ref[...] - tb))        # (Db, P) f32
    wg = jnp.maximum(0.0, 1.0 - jnp.abs(gcol_ref[...] - tg))        # (Dg, P) f32
    wr = jnp.maximum(0.0, 1.0 - jnp.abs(rcol_ref[...] - tr))        # (Di, P) f32

    # Bilinear (b, g) plane weights as an outer product, fused into a single bf16 multiply
    # (packed vregs: ~2x VALU throughput on v6e/v7x).  Dg is a multiple of 16 so the
    # (Db, Dg, P) -> (Db*Dg, P) merge is layout-preserving for packed bf16 tiles.
    wb16 = wb.astype(jnp.bfloat16)
    wg16 = wg.astype(jnp.bfloat16)
    wbg = (wb16[:, None, :] * wg16[None, :, :]).reshape(db * dg, p)  # (K, P) bf16, 4 nz/col

    # (3*Di, K) @ (K, P) -> (3*Di, P): per pixel, the LUT line along r for every output
    # channel, already bilinearly interpolated over (b, g).  bf16 operands, f32 accumulation.
    s = jax.lax.dot_general(
        lut_ref[...], wbg,
        dimension_numbers=(((1,), (0,)), ((), ())),
        preferred_element_type=jnp.float32)

    # Final linear interpolation along r: one VPU multiply + sublane reduction, no concatenate.
    s3 = s.reshape(3, di, p)
    o_ref[0] = jnp.sum(s3 * wr[None, :, :], axis=1).astype(o_ref.dtype)


def trilinear_interpolation(lut, x, *, block_pixels=None, vmem_budget=None, vmem_limit=None):
    """Pallas equivalent of TrilinearInterpolation.forward(lut, x) -> (lut, output)."""
    batch, c, H, W = x.shape
    assert c == 3, "expects 3-channel (RGB) input in NCHW layout"
    dim = lut.shape[-1]
    assert lut.shape == (3, dim, dim, dim)
    binsize = 1.000001 / (dim - 1)
    inv_bin = 1.0 / binsize

    tune = _tpu_tuning()
    block_pixels = block_pixels or tune["block_pixels"]
    vmem_budget = vmem_budget or tune["vmem_budget"]
    vmem_limit = vmem_limit or tune["vmem_limit"]

    di = _round_up(dim, 8)    # red rows per channel: 8-aligned for the (3, Di, P) split
    dg = _round_up(dim, 16)   # green axis: 16-aligned so the bf16 outer-product merge is tile-aligned
    db = dim                  # blue axis stays unpadded (leading dim of the outer product)
    K = db * dg

    # LUT (3, b, g, r) -> rows (channel, r) x cols (b major, g minor), bf16, zero padded (one-time).
    lut2 = jnp.transpose(lut, (0, 3, 1, 2))                           # (3, r, b, g)
    lut2 = jnp.pad(lut2, ((0, 0), (0, di - dim), (0, 0), (0, dg - dim)))
    lut2 = lut2.reshape(3 * di, K).astype(jnp.bfloat16)

    bcol = jnp.arange(db, dtype=jnp.float32).reshape(db, 1)
    g_idx = jnp.arange(dg, dtype=jnp.float32)
    gcol = jnp.where(g_idx < dim, g_idx, jnp.float32(-2.0)).reshape(dg, 1)  # pad rows -> weight 0
    rcol = jnp.arange(di, dtype=jnp.float32).reshape(di, 1)

    # Pixel block: multiple of 128 lanes, capped so the live intermediates (bf16 wbg + possible
    # broadcast temp, f32 tents, f32 s, pipelined in/out blocks) fit the per-generation budget.
    npix = H * W
    per_pixel_bytes = 2 * (2 * K) + 4 * (db + dg + 2 * di) + 4 * (3 * di) + 64
    p_cap = max(128, (vmem_budget // per_pixel_bytes) // 128 * 128)
    P = max(128, min(block_pixels, p_cap) // 128 * 128)
    P = min(P, _round_up(npix, 128))
    # Avoid the wrapper-side pad + tail-slice HBM passes whenever H*W allows it.
    if npix % 128 == 0:
        while npix % P != 0:
            P -= 128
    n_pad = _round_up(npix, P)
    # v7x has 2 TensorCores: make sure tiny problems still produce >= 2 grid steps.
    if batch * (n_pad // P) < 2 and P % 256 == 0:
        P //= 2
        if npix % 128 == 0:
            while npix % P != 0:
                P -= 128
        n_pad = _round_up(npix, P)

    # NCHW -> (B, 3, H*W): a free reshape (no transpose, no extra HBM pass, no dtype cast).
    xr = x.reshape(batch, 3, npix)
    if n_pad != npix:
        xr = jnp.pad(xr, ((0, 0), (0, 0), (0, n_pad - npix)))

    kernel = functools.partial(_trilinear_kernel, inv_bin=inv_bin)

    # TODO(synk): pipeline_mode=pl.Buffered(1) on the resident operands (bcol/gcol/rcol/lut2)
    # would drop their second pipeline buffer (~0.4 MB); left at the default for robustness.
    out = pl.pallas_call(
        kernel,
        out_shape=jax.ShapeDtypeStruct((batch, 3, n_pad), x.dtype),
        grid_spec=pltpu.PrefetchScalarGridSpec(
            num_scalar_prefetch=0,
            grid=(batch, n_pad // P),
            in_specs=[
                pl.BlockSpec((db, 1), lambda b, i: (0, 0)),        # bcol (VMEM-resident)
                pl.BlockSpec((dg, 1), lambda b, i: (0, 0)),        # gcol (VMEM-resident)
                pl.BlockSpec((di, 1), lambda b, i: (0, 0)),        # rcol (VMEM-resident)
                pl.BlockSpec((3 * di, K), lambda b, i: (0, 0)),    # LUT  (VMEM-resident)
                pl.BlockSpec((1, 3, P), lambda b, i: (b, 0, i)),   # pixel block
            ],
            out_specs=pl.BlockSpec((1, 3, P), lambda b, i: (b, 0, i)),
        ),
        compiler_params=pltpu.CompilerParams(
            dimension_semantics=("parallel", "parallel"),
            vmem_limit_bytes=vmem_limit),
    )(bcol, gcol, rcol, lut2, xr)

    if n_pad != npix:
        out = out[:, :, :npix]
    return lut, out.reshape(batch, 3, H, W)


def _reference_trilinear(lut, x):
    """Pure-JAX reference mirroring the CUDA kernel math (floor / fmod / 8 corner gathers)."""
    dim = lut.shape[-1]
    d3 = dim ** 3
    binsize = jnp.float32(1.000001 / (dim - 1))
    lut_flat = lut.reshape(3, d3).astype(jnp.float32)

    xf = x.astype(jnp.float32)
    r, g, b = xf[:, 0], xf[:, 1], xf[:, 2]
    r_id = jnp.floor(r / binsize).astype(jnp.int32)
    g_id = jnp.floor(g / binsize).astype(jnp.int32)
    b_id = jnp.floor(b / binsize).astype(jnp.int32)
    r_d = jnp.mod(r, binsize) / binsize
    g_d = jnp.mod(g, binsize) / binsize
    b_d = jnp.mod(b, binsize) / binsize

    out_c = [jnp.zeros_like(r) for _ in range(3)]
    for dr in (0, 1):
        for dg_ in (0, 1):
            for db_ in (0, 1):
                w = ((r_d if dr else (1.0 - r_d)) *
                     (g_d if dg_ else (1.0 - g_d)) *
                     (b_d if db_ else (1.0 - b_d)))
                idx = (r_id + dr) + (g_id + dg_) * dim + (b_id + db_) * (dim * dim)
                for cc in range(3):
                    out_c[cc] = out_c[cc] + w * jnp.take(lut_flat[cc], idx)
    return jnp.stack(out_c, axis=1).astype(x.dtype)


if __name__ == "__main__":
    key = jax.random.PRNGKey(0)
    k_lut, k_x = jax.random.split(key)

    dim = 33                      # standard image-adaptive-3DLUT resolution
    batch, H, W = 2, 16, 16

    lut = jax.random.uniform(k_lut, (3, dim, dim, dim), dtype=jnp.float32)
    x = jax.random.uniform(k_x, (batch, 3, H, W), dtype=jnp.float32,
                           minval=0.0, maxval=1.0)

    lut_out, y = trilinear_interpolation(lut, x)
    y = jax.block_until_ready(y)

    y_ref = _reference_trilinear(lut, x)
    assert y.shape == x.shape
    assert y.dtype == x.dtype
    assert bool(jnp.all(lut_out == lut))
    err = float(jnp.max(jnp.abs(y - y_ref)))
    # Tolerance sized for the bf16 corner-weight / bf16 LUT MXU path (f32 accumulation);
    # analytic bound ~1e-2 for LUT values in [0, 1].
    assert err < 2e-2, err
    print("KERNEL_OK")
</pallas_src>

<mosaic_0001>
module attributes {stable_mosaic.version = 11 : i64} {
  func.func @_trilinear_kernel(%arg0: i32, %arg1: i32, %arg2: memref<33x1xf32, #tpu.memory_space<vmem>>, %arg3: memref<48x1xf32, #tpu.memory_space<vmem>>, %arg4: memref<40x1xf32, #tpu.memory_space<vmem>>, %arg5: memref<120x1584xbf16, #tpu.memory_space<vmem>>, %arg6: memref<1x3x256xf32, #tpu.memory_space<vmem>>, %arg7: memref<1x3x256xf32, #tpu.memory_space<vmem>>) attributes {dimension_semantics = [#tpu.dimension_semantics<parallel>, #tpu.dimension_semantics<parallel>], iteration_bounds = array<i64: 2, 1>, scalar_prefetch = 0 : i64, scratch_operands = 0 : i64, tpu.core_type = #tpu.core_type<tc>, window_params = [{pipeline_mode = #tpu.pipeline_mode<synchronous>, transform_indices = @transform_0, window_bounds = array<i64: 33, 1>}, {pipeline_mode = #tpu.pipeline_mode<synchronous>, transform_indices = @transform_1, window_bounds = array<i64: 48, 1>}, {pipeline_mode = #tpu.pipeline_mode<synchronous>, transform_indices = @transform_2, window_bounds = array<i64: 40, 1>}, {pipeline_mode = #tpu.pipeline_mode<synchronous>, transform_indices = @transform_3, window_bounds = array<i64: 120, 1584>}, {transform_indices = @transform_4, window_bounds = array<i64: 1, 3, 256>}, {transform_indices = @transform_5, window_bounds = array<i64: 1, 3, 256>}]} {
    %c0 = arith.constant 0 : index
    %c0_0 = arith.constant 0 : index
    %c0_1 = arith.constant 0 : index
    %0 = vector.load %arg6[%c0, %c0_0, %c0_1] : memref<1x3x256xf32, #tpu.memory_space<vmem>>, vector<1x3x256xf32>
    %1 = vector.shape_cast %0 : vector<1x3x256xf32> to vector<3x256xf32>
    %cst = arith.constant 31.9999676 : f32
    %2 = vector.broadcast %cst : f32 to vector<3x256xf32>
    %3 = arith.mulf %1, %2 : vector<3x256xf32>
    %4 = vector.extract_strided_slice %3 {offsets = [0, 0], sizes = [1, 256], strides = [1, 1]} : vector<3x256xf32> to vector<1x256xf32>
    %5 = vector.extract_strided_slice %3 {offsets = [1, 0], sizes = [1, 256], strides = [1, 1]} : vector<3x256xf32> to vector<1x256xf32>
    %6 = vector.extract_strided_slice %3 {offsets = [2, 0], sizes = [1, 256], strides = [1, 1]} : vector<3x256xf32> to vector<1x256xf32>
    %c0_2 = arith.constant 0 : index
    %c0_3 = arith.constant 0 : index
    %7 = vector.load %arg2[%c0_2, %c0_3] : memref<33x1xf32, #tpu.memory_space<vmem>>, vector<33x1xf32>
    %8 = vector.broadcast %7 : vector<33x1xf32> to vector<33x256xf32>
    %9 = vector.broadcast %6 : vector<1x256xf32> to vector<33x256xf32>
    %10 = arith.subf %8, %9 : vector<33x256xf32>
    %11 = math.absf %10 : vector<33x256xf32>
    %cst_4 = arith.constant 1.000000e+00 : f32
    %12 = vector.broadcast %cst_4 : f32 to vector<33x256xf32>
    %13 = arith.subf %12, %11 : vector<33x256xf32>
    %cst_5 = arith.constant 0.000000e+00 : f32
    %14 = vector.broadcast %cst_5 : f32 to vector<33x256xf32>
    %15 = arith.maximumf %14, %13 : vector<33x256xf32>
    %c0_6 = arith.constant 0 : index
    %c0_7 = arith.constant 0 : index
    %16 = vector.load %arg3[%c0_6, %c0_7] : memref<48x1xf32, #tpu.memory_space<vmem>>, vector<48x1xf32>
    %17 = vector.broadcast %16 : vector<48x1xf32> to vector<48x256xf32>
    %18 = vector.broadcast %5 : vector<1x256xf32> to vector<48x256xf32>
    %19 = arith.subf %17, %18 : vector<48x256xf32>
    %20 = math.absf %19 : vector<48x256xf32>
    %cst_8 = arith.constant 1.000000e+00 : f32
    %21 = vector.broadcast %cst_8 : f32 to vector<48x256xf32>
    %22 = arith.subf %21, %20 : vector<48x256xf32>
    %cst_9 = arith.constant 0.000000e+00 : f32
    %23 = vector.broadcast %cst_9 : f32 to vector<48x256xf32>
    %24 = arith.maximumf %23, %22 : vector<48x256xf32>
    %c0_10 = arith.constant 0 : index
    %c0_11 = arith.constant 0 : index
    %25 = vector.load %arg4[%c0_10, %c0_11] : memref<40x1xf32, #tpu.memory_space<vmem>>, vector<40x1xf32>
    %26 = vector.broadcast %25 : vector<40x1xf32> to vector<40x256xf32>
    %27 = vector.broadcast %4 : vector<1x256xf32> to vector<40x256xf32>
    %28 = arith.subf %26, %27 : vector<40x256xf32>
    %29 = math.absf %28 : vector<40x256xf32>
    %cst_12 = arith.constant 1.000000e+00 : f32
    %30 = vector.broadcast %cst_12 : f32 to vector<40x256xf32>
    %31 = arith.subf %30, %29 : vector<40x256xf32>
    %cst_13 = arith.constant 0.000000e+00 : f32
    %32 = vector.broadcast %cst_13 : f32 to vector<40x256xf32>
    %33 = arith.maximumf %32, %31 : vector<40x256xf32>
    %34 = arith.truncf %15 : vector<33x256xf32> to vector<33x256xbf16>
    %35 = arith.truncf %24 : vector<48x256xf32> to vector<48x256xbf16>
    %36 = vector.shape_cast %34 : vector<33x256xbf16> to vector<33x1x256xbf16>
    %37 = vector.shape_cast %35 : vector<48x256xbf16> to vector<1x48x256xbf16>
    %38 = vector.broadcast %36 : vector<33x1x256xbf16> to vector<33x48x256xbf16>
    %39 = vector.broadcast %37 : vector<1x48x256xbf16> to vector<33x48x256xbf16>
    %40 = arith.mulf %38, %39 : vector<33x48x256xbf16>
    %41 = vector.shape_cast %40 : vector<33x48x256xbf16> to vector<1584x256xbf16>
    %c0_14 = arith.constant 0 : index
    %c0_15 = arith.constant 0 : index
    %42 = vector.load %arg5[%c0_14, %c0_15] : memref<120x1584xbf16, #tpu.memory_space<vmem>>, vector<120x1584xbf16>
    %cst_16 = arith.constant dense<0.000000e+00> : vector<120x256xf32>
    %43 = tpu.matmul %42, %41, %cst_16 {dimension_numbers = #tpu.dot_dimension_numbers<[1], [0], [0], [1], [0, 0, 1, 1], [], []>} : vector<120x1584xbf16>, vector<1584x256xbf16>, vector<120x256xf32> -> vector<120x256xf32>
    %44 = vector.shape_cast %43 : vector<120x256xf32> to vector<3x40x256xf32>
    %45 = vector.shape_cast %33 : vector<40x256xf32> to vector<1x40x256xf32>
    %46 = vector.broadcast %45 : vector<1x40x256xf32> to vector<3x40x256xf32>
    %47 = arith.mulf %44, %46 : vector<3x40x256xf32>
    %cst_17 = arith.constant dense<0.000000e+00> : vector<3x256xf32>
    %48 = vector.multi_reduction <add>, %47, %cst_17 [1] : vector<3x40x256xf32> to vector<3x256xf32>
    %c0_18 = arith.constant 0 : index
    %c0_19 = arith.constant 0 : index
    %c0_20 = arith.constant 0 : index
    %49 = vector.load %arg7[%c0_18, %c0_19, %c0_20] : memref<1x3x256xf32, #tpu.memory_space<vmem>>, vector<1x3x256xf32>
    %50 = vector.shape_cast %49 : vector<1x3x256xf32> to vector<3x256xf32>
    %51 = vector.shape_cast %48 : vector<3x256xf32> to vector<1x3x256xf32>
    tpu.vector_store %arg7[%c0_18, %c0_19, %c0_20], %51 {strides = array<i32>} : memref<1x3x256xf32, #tpu.memory_space<vmem>>, vector<1x3x256xf32>,
    return
  }
  func.func @transform_0(%arg0: i32, %arg1: i32) -> (i32, i32) {
    %c0_i32 = arith.constant 0 : i32
    %c0_i32_0 = arith.constant 0 : i32
    %c0_i32_1 = arith.constant 0 : i32
    return %c0_i32, %c0_i32_0 : i32, i32
  }
  func.func @transform_1(%arg0: i32, %arg1: i32) -> (i32, i32) {
    %c0_i32 = arith.constant 0 : i32
    %c0_i32_0 = arith.constant 0 : i32
    %c0_i32_1 = arith.constant 0 : i32
    return %c0_i32, %c0_i32_0 : i32, i32
  }
  func.func @transform_2(%arg0: i32, %arg1: i32) -> (i32, i32) {
    %c0_i32 = arith.constant 0 : i32
    %c0_i32_0 = arith.constant 0 : i32
    %c0_i32_1 = arith.constant 0 : i32
    return %c0_i32, %c0_i32_0 : i32, i32
  }
  func.func @transform_3(%arg0: i32, %arg1: i32) -> (i32, i32) {
    %c0_i32 = arith.constant 0 : i32
    %c0_i32_0 = arith.constant 0 : i32
    %c0_i32_1 = arith.constant 0 : i32
    return %c0_i32, %c0_i32_0 : i32, i32
  }
  func.func @transform_4(%arg0: i32, %arg1: i32) -> (i32, i32, i32) {
    %c0_i32 = arith.constant 0 : i32
    %c0_i32_0 = arith.constant 0 : i32
    return %arg0, %c0_i32, %arg1 : i32, i32, i32
  }
  func.func @transform_5(%arg0: i32, %arg1: i32) -> (i32, i32, i32) {
    %c0_i32 = arith.constant 0 : i32
    %c0_i32_0 = arith.constant 0 : i32
    return %arg0, %c0_i32, %arg1 : i32, i32, i32
  }
}

</mosaic_0001>

<bundles_post_ra>
// kernel: tpu_custom_call.1
= control target key start
LH: loop header
LB: loop body
LE: loop exit
PB: predicated region body
PF: predicated region fallthrough
CT: control target
= control target key end

     0   :  { %10 = vsyncpa [#allocation3], 0  ;;  %s3946_s18 = smov 0   ;;  %s3948_s19 = smov 0   ;;  %s4950_s0 = inlined_call_operand.vmem [shape: f32[33,1], index: 0, kind: input, shape index: {}]   ;;  %s4951_s1 = inlined_call_operand.vmem [shape: f32[48,1], index: 1, kind: input, shape index: {}]   ;;  %s4952_s2 = inlined_call_operand.vmem [shape: f32[40,1], index: 2, kind: input, shape index: {}]   ;;  %s4953_s3 = inlined_call_operand.hbm [shape: bf16[120,1584], index: 3, kind: input, shape index: {}]   ;;  %s4954_s4 = inlined_call_operand.vmem [shape: f32[2,3,256], index: 4, kind: input, shape index: {}]   ;;  %s4955_s5 = inlined_call_operand.vmem [shape: f32[2,3,256], index: 5, kind: output, shape index: {}]  }
   0x1   :  { %s3950_s20 = smov 0  }
   0x2 LB: > { %s3301_s21 = sadd.s32 4294967295, %s3909_s20   ;;  %s28_s22 = sadd.s32 1, %s3905_s19  ;;  %s3909_s20 = sphi %s3950_s20, %s16_s20   ;;  %s3905_s19 = sphi %s3948_s19, %s4965_s19   ;;  %s3901_s18 = sphi %s3946_s18, %s4964_s18  }
   0x3   : > { %p30_p0 = scmp.ge.s32.totalorder %s28_s22, 2  ;;  %p3303_p1 = scmp.ge.s32.totalorder %s3909_s20, 1 }
   0x4   : > { %p173_p2 = scmp.lt.s32.totalorder %s3909_s20, 3  ;;  %p3971_p4 = scmp.eq.s32.totalorder %s3301_s21, 0 }
   0x5   : > { %s4967_s22 = smov (%p30_p0, %s28_s22), 0  ;;  %s3911_s25 = smov [#allocation2]  }
   0x6   : > { %p3967_p3 = pnand %p3303_p1, %p173_p2  ;;  %s194_s26 = sshll.u32 %s3911_s25, 4  ;;  %s195_s26 = int_to_ptr.vmem [resolvable:$true] %s194_s26 }
   0x7   : > { %s4960_s24 = scalar_select %p3971_p4, 1, 0 }
   0x8   : > { %s4959_s23 = scalar_select %p3967_p3, 1, 0 }
   0x9   : > { %p3672_p5 = pneg %p3967_p3  ;;  %s3855_s30 = scalar_lea.hbm %s4953_s3, 12480 }
   0xa   : > { %p3856_p7 = scmp.ne.s32.totalorder %s4953_s3, %s3855_s30  ;;  %p3862_p11 = scmp.lt.u32.totalorder %s3855_s30, %s4953_s3 }
   0xb   : > { %p3979_p6 = pnand %p3971_p4, %p3672_p5 }
   0xd   : > { %p3857_p8 = pneg %p3979_p6 }
   0xf   : > { %p3858_p9 = pnand %p3857_p8, %p3856_p7 }
  0x11   : > { %p3859_p10 = pneg %p3858_p9 }
  0x13   : > { %p3864_p12 = pnand %p3862_p11, %p3859_p10 }
  0x15   : > { %3867 = shalt.err (!%p3864_p12)
}
  0x16   : > { %s3868_s10 = scalar_lea.vmem %s195_s26, 12480  ;;  %p3876_p2 = scmp.lt.s32.totalorder %s195_s26, %s195_s26 }
  0x17   : > { %p3869_p13 = scmp.ne.s32.totalorder %s195_s26, %s3868_s10  ;;  %p3877_p5 = scmp.lt.s32.totalorder %s3868_s10, %s3868_s10 }
  0x19   : > { %p3871_p0 = pnand %p3869_p13, %p3857_p8  ;;  %p3878_p4 = por %p3877_p5, %p3876_p2 }
  0x1b   : > { %p3872_p1 = pneg %p3871_p0 }
  0x1d   : > { %p3879_p3 = pnand %p3878_p4, %p3872_p1 }
  0x1f   : > { %3882 = shalt.err (!%p3879_p3)
}
  0x20   : > { %s3912_s11 = smov 832   ;;  %s3913_s12 = smov 52  }
  0x21   : > { %3675 = dma.hbm_to_vmem [thread:$0]  (!%p3979_p6), %s4953_s3, 12480, %s195_s26, [#allocation3], %s3912_s11, %s3912_s11, %s3913_s12  }
  0x22   : > { %p4962_p7 = scmp.ne.s32.totalorder %s4959_s23, 0 }
  0x23   : > { %p4963_p9 = scmp.ne.s32.totalorder (!%p4962_p7), %s4960_s24, 0 }
  0x24   : > { %223 = sbr.rel (%p4962_p7) target bundleno = 736 (0x2e0), region = 40 }
  0x2b   : > { %3896 = dma.done.wait (%p4963_p9), [#allocation3], 12480  }
  0x2c   : > { %3898 = vsyncadd (%p4963_p9), [#allocation3], 4294954816  ;;  %v3914_v0 = vmov 0   ;;  %v371_v1 = vld [vmem:[%s4951_s1] sm:$0xff]  ;;  %v372_v3 = vld [vmem:[%s4951_s1 + $0x8] sm:$0xff]  ;;  %p260_p3 = scmp.lt.s32.totalorder %s3901_s18, 1  ;;  %v313_v11 = vlaneseq }
  0x2d   : > { %3708 = vset.pattern.permute.xlu1 %v3914_v0  ;;  %3707 = vset.pattern.permute.xlu0 %v3914_v0  ;;  %v282_v2 = vld [vmem:[%s4950_s0] sm:$0xff]  ;;  %v284_v4 = vld [vmem:[%s4950_s0 + $0x10] sm:$0xff]  ;;  %v374_v5 = vld [vmem:[%s4951_s1 + $0x18] sm:$0xff]  ;;  %v3915_v53 = vmov 1966171168   ;;  %vm2289_vm0 = vcmask 392192  }
  0x2e   : > { %379 = vperm.xlu1 %3708, %v371_v1   ;;  %289 = vperm.xlu0 %3707, %v282_v2   ;;  %v373_v6 = vld [vmem:[%s4951_s1 + $0x10] sm:$0xff]  ;;  %s4969_s18 = smov (!%p260_p3, %s3901_s18), 1  ;;  %v376_v7 = vld [vmem:[%s4951_s1 + $0x28] sm:$0xff]  ;;  %v375_v8 = vld [vmem:[%s4951_s1 + $0x20] sm:$0xff]  ;;  %v4053_v15 = vshrl.u32 %v313_v11, 7  ;;  %v582_v54 = vunpack.c.l.s4 %v3915_v53  ;;  %vm3191_vm1 = vcmask 1041409  }
  0x2f   : > { %s3448_s10 = sshll.u32 %s4969_s18, 3  ;;  %v285_v9 = vld [vmem:[%s4950_s0 + $0x18] sm:$0xff]  ;;  %v283_v10 = vld [vmem:[%s4950_s0 + $0x8] sm:$0xff]  ;;  %v473_v12 = vld [vmem:[%s4952_s2] sm:$0xff]  ;;  %vm3193_vm2 = vcmask 1045509   ;;  %vm3196_vm3 = vcmask 1042434  }
  0x30   : > { %s267_s17 = scalar_lea.vmem %s4954_s4, %s3448_s10  ;;  %v286_v13 = vld [vmem:[%s4950_s0 + $0x20] sm:$0x1]  ;;  %v475_v16 = vld [vmem:[%s4952_s2 + $0x10] sm:$0xff]  ;;  %v474_v17 = vld [vmem:[%s4952_s2 + $0x8] sm:$0xff]  ;;  %v509_v19 = vsub.s32 4, %v4053_v15  ;;  %v315_v25 = vsub.s32 2, %v4053_v15  ;;  %v583_v63 = vunpack.c.0.s8 %v582_v54  ;;  %s277_s12 = scalar_lea.vmem %s4955_s5, %s3448_s10 }
  0x31   : > { %v280_v14 = vld [vmem:[%s267_s17] sm:$0x77]  ;;  %v476_v22 = vld [vmem:[%s4952_s2 + $0x18] sm:$0xff]  ;;  %v319_v26 = vsub.s32 6, %v4053_v15  ;;  %v4078_v29 = vsub.s32 1, %v4053_v15  ;;  %v413_v32 = vsub.s32 5, %v4053_v15 }
  0x32   : > { %384 = vperm.xlu1 %3708, %v372_v3   ;;  %299 = vperm.xlu0 %3707, %v284_v4   ;;  %v4061_v18 = vmul.f32 31.999968, %v280_v14  ;;  %v477_v21 = vld [vmem:[%s4952_s2 + $0x20] sm:$0xff]  ;;  %v3714_v24 = vld [vmem:[#allocation2 + $0x1c] ss:$52 sps:$4 sm:$0xff]   ;;  %vm3198_vm4 = vcmask 1046534  }
  0x33   : > { %v3711_v23 = vld [vmem:[#allocation2 + $0x4] ss:$52 sps:$4 sm:$0xff]   ;;  %2679 = vmatprep.mubr.bf16.mxu0 %v3714_v24 }
  0x34   : > { %v4065_v20 = vrot.slane %v4061_v18, %v509_v19  ;;  %2346 = vmatprep.mubr.bf16.mxu1 %v3711_v23  ;;  %v316_v27 = vrot.slane %v4061_v18, %v315_v25  ;;  %v320_v28 = vrot.slane %v4061_v18, %v319_v26  ;;  %v410_v35 = vrot.slane %v4061_v18, %v4078_v29 }
  0x35   : > { %v414_v38 = vrot.slane %v4061_v18, %v413_v32 }
  0x36   : > { %394 = vperm.xlu1 %3708, %v374_v5   ;;  %389 = vperm.xlu0 %3707, %v373_v6   ;;  %v4081_v33 = vrot.slane %v316_v27, %v315_v25  ;;  %v4083_v34 = vrot.slane %v320_v28, %v315_v25  ;;  %v4091_v41 = vrot.slane %v410_v35, %v4078_v29 }
  0x37   : > { %v4098_v44 = vrot.slane %v414_v38, %v4078_v29 }
  0x3a   : > { %404 = vperm.xlu1 %3708, %v376_v7   ;;  %399 = vperm.xlu0 %3707, %v375_v8  }
  0x3e   : > { %304 = vperm.xlu1 %3708, %v285_v9   ;;  %294 = vperm.xlu0 %3707, %v283_v10   ;;  %v4112_v10 = vsub.s32 0, %v4053_v15 }
  0x42   : > { %480 = vperm.xlu1 %3708, %v473_v12   ;;  %309 = vperm.xlu0 %3707, %v286_v13   ;;  %v4115_v12 = vsub.s32 %v583_v63, %v4053_v15 }
  0x46   : > { %490 = vperm.xlu1 %3708, %v475_v16   ;;  %485 = vperm.xlu0 %3707, %v474_v17  }
  0x4a   : > { %500 = vperm.xlu1 %3708, %v477_v21   ;;  %495 = vperm.xlu0 %3707, %v476_v22  }
  0xad   : > { %v380_v30 = vpop.permute.xlu1 %379  ;;  %v290_v31 = vpop.permute.xlu0 %289 }
  0xae   : > { %v331_v39 = vsub.f32 %v290_v31, %v4081_v33  ;;  %v332_v40 = vsub.f32 %v290_v31, %v4083_v34  ;;  %v425_v45 = vsub.f32 %v380_v30, %v4091_v41  ;;  %v426_v48 = vsub.f32 %v380_v30, %v4098_v44 }
  0xb0   : > { %v341_v46 = vand.u32 2147483647, %v331_v39  ;;  %v342_v47 = vand.u32 2147483647, %v332_v40  ;;  %v437_v55 = vand.u32 2147483647, %v425_v45 }
  0xb1   : > { %v385_v36 = vpop.permute.xlu1 %384  ;;  %v300_v37 = vpop.permute.xlu0 %299  ;;  %v438_v58 = vand.u32 2147483647, %v426_v48 }
  0xb2   : > { %v335_v49 = vsub.f32 %v300_v37, %v4081_v33  ;;  %v336_v51 = vsub.f32 %v300_v37, %v4083_v34  ;;  %v351_v56 = vsub.f32 1.0, %v341_v46  ;;  %v352_v57 = vsub.f32 1.0, %v342_v47 }
  0xb3   : > { %v427_v59 = vsub.f32 %v385_v36, %v4091_v41  ;;  %v449_v1 = vsub.f32 1.0, %v437_v55  ;;  %v428_v2 = vsub.f32 %v385_v36, %v4098_v44  ;;  %v450_v7 = vsub.f32 1.0, %v438_v58 }
  0xb4   : > { %v345_v60 = vand.u32 2147483647, %v335_v49  ;;  %v346_v62 = vand.u32 2147483647, %v336_v51  ;;  %v361_v3 = vmax.f32 %v351_v56, 0.0  ;;  %v362_v4 = vmax.f32 %v352_v57, 0.0 }
  0xb5   : > { %v4093_v42 = vpop.permute.xlu1 %394  ;;  %v4095_v43 = vpop.permute.xlu0 %389  ;;  %v439_v8 = vand.u32 2147483647, %v427_v59  ;;  %v4117_v13 = vmax.f32 %v449_v1, 0.0  ;;  %v4119_v14 = vand.u32 2147483647, %v428_v2  ;;  %v4124_v23 = vmax.f32 %v450_v7, 0.0 }
  0xb6   : > { %v355_v9 = vsub.f32 1.0, %v345_v60  ;;  %v356_v11 = vsub.f32 1.0, %v346_v62  ;;  %v3312_v17 = vpack.c.bf16 %v362_v4, %v361_v3  ;;  %v431_v35 = vsub.f32 %v4093_v42, %v4091_v41 }
  0xb7   : > { %v451_v24 = vsub.f32 1.0, %v439_v8  ;;  %v452_v32 = vsub.f32 1.0, %v4119_v14  ;;  %v432_v36 = vsub.f32 %v4093_v42, %v4098_v44  ;;  %v430_v46 = vsub.f32 %v4095_v43, %v4098_v44 }
  0xb8   : > { %v365_v25 = vmax.f32 %v355_v9, 0.0  ;;  %v366_v27 = vmax.f32 %v356_v11, 0.0  ;;  %v4132_v38 = vrot.slane %v3312_v17, %v4115_v12  ;;  %v429_v53 = vsub.f32 %v4095_v43, %v4091_v41 }
  0xb9   : > { %v4103_v50 = vpop.permute.xlu1 %404  ;;  %v4106_v52 = vpop.permute.xlu0 %399  ;;  %v444_v55 = vand.u32 2147483647, %v432_v36  ;;  %v443_v17 = vand.u32 2147483647, %v431_v35 }
  0xba   : > { %v3314_v51 = vpack.c.bf16 %v366_v27, %v365_v25  ;;  %v4142_v59 = vrot.slane %v4132_v38, %v4115_v12  ;;  %v436_v60 = vsub.f32 %v4103_v50, %v4098_v44  ;;  %v435_v2 = vsub.f32 %v4103_v50, %v4091_v41 }
  0xbb   : > { %v433_v3 = vsub.f32 %v4106_v52, %v4091_v41 }
  0xbc   : > { %v4150_v1 = vrot.slane %v3314_v51, %v4115_v12  ;;  %v448_v8 = vand.u32 2147483647, %v436_v60 }
  0xbd   : > { %v305_v61 = vpop.permute.xlu1 %304  ;;  %v295_v6 = vpop.permute.xlu0 %294 }
  0xbe   : > { %v337_v5 = vsub.f32 %v305_v61, %v4081_v33  ;;  %v338_v16 = vsub.f32 %v305_v61, %v4083_v34  ;;  %v333_v21 = vsub.f32 %v295_v6, %v4081_v33  ;;  %v334_v22 = vsub.f32 %v295_v6, %v4083_v34 }
  0xbf   : > { %v442_v61 = vand.u32 2147483647, %v430_v46 }
  0xc0   : > { %v347_v19 = vand.u32 2147483647, %v337_v5  ;;  %v348_v26 = vand.u32 2147483647, %v338_v16  ;;  %v343_v28 = vand.u32 2147483647, %v333_v21 }
  0xc1   : > { %v344_v30 = vand.u32 2147483647, %v334_v22  ;;  %v310_v31 = vpop.permute.xlu0 %309  ;;  %v463_v16 = vmax.f32 %v451_v24, 0.0  ;;  %v441_v21 = vand.u32 2147483647, %v429_v53  ;;  %v454_v25 = vsub.f32 1.0, %v442_v61 }
  0xc2   : > { %v357_v15 = vsub.f32 1.0, %v347_v19  ;;  %v358_v37 = vsub.f32 1.0, %v348_v26  ;;  %v353_v40 = vsub.f32 1.0, %v343_v28  ;;  %v339_v48 = vsub.f32 %v310_v31, %v4081_v33 }
  0xc3   : > { %v354_v45 = vsub.f32 1.0, %v344_v30  ;;  %v340_v49 = vsub.f32 %v310_v31, %v4083_v34  ;;  %v434_v33 = vsub.f32 %v4106_v52, %v4098_v44  ;;  %v4168_v52 = vrot.slane %v4150_v1, %v4115_v12 }
  0xc4   : > { %v367_v39 = vmax.f32 %v357_v15, 0.0  ;;  %v368_v47 = vmax.f32 %v358_v37, 0.0  ;;  %v363_v42 = vmax.f32 %v353_v40, 0.0  ;;  %v349_v57 = vand.u32 2147483647, %v339_v48 }
  0xc5   : > { %v364_v54 = vmax.f32 %v354_v45, 0.0  ;;  %v350_v58 = vand.u32 2147483647, %v340_v49  ;;  %v446_v9 = vand.u32 2147483647, %v434_v33  ;;  %v456_v19 = vsub.f32 1.0, %v444_v55 }
  0xc6   : > { %v3315_v56 = vpack.c.bf16 %v368_v47, %v367_v39  ;;  %v359_v62 = vsub.f32 1.0, %v349_v57  ;;  %v447_v26 = vand.u32 2147483647, %v435_v2  ;;  %v3317_v24 = vpack.i.b16 %v4142_v59, %v4142_v59 }
  0xc7   : > { %v3313_v34 = vpack.c.bf16 %v364_v54, %v363_v42  ;;  %v360_v63 = vsub.f32 1.0, %v350_v58  ;;  %v464_v15 = vmax.f32 %v452_v32, 0.0  ;;  %v460_v28 = vsub.f32 1.0, %v448_v8 }
  0xc8   : > { %v644_v43 = vrot.slane %v3315_v56, %v4115_v12  ;;  %v369_v6 = vmax.f32 %v359_v62, 0.0  ;;  %v445_v30 = vand.u32 2147483647, %v433_v3  ;;  %v458_v31 = vsub.f32 1.0, %v446_v9 }
  0xc9   : > { %v594_v4 = vrot.slane %v3313_v34, %v4115_v12  ;;  %v370_v7 = vmax.f32 %v360_v63, 0.0  ;;  %v4177_v35 = vpack.c.bf16 %v463_v16, %v4117_v13  ;;  %v767_v37 = vrot.slane %v3317_v24, %v4078_v29 }
  0xca   : > { %v646_v5 = vcombine.high %v644_v43, %v644_v43  ;;  %v4158_v44 = vrot.slane %v644_v43, %v4115_v12  ;;  %v763_v39 = vrot.slane %v3317_v24, %v4112_v10  ;;  %v455_v40 = vsub.f32 1.0, %v443_v17 }
  0xcb   : > { %v596_v11 = vcombine.high %v594_v4, %v594_v4  ;;  %v4161_v14 = vrot.slane %v594_v4, %v4115_v12  ;;  %v3316_v41 = vpack.c.bf16 %v370_v7, %v369_v6  ;;  %v468_v45 = vmax.f32 %v456_v19, 0.0 }
  0xcc   : > { %v4164_v50 = vrot.slane %v646_v5, %v4115_v12  ;;  %v453_v46 = vsub.f32 1.0, %v441_v21  ;;  %v3325_v47 = vpack.i.b16 %v4168_v52, %v4168_v52  ;;  %v466_v32 = vmax.f32 %v454_v25, 0.0 }
  0xcd   : > { %v4171_v22 = vrot.slane %v596_v11, %v4115_v12  ;;  %v686_v27 = vrot.slane %v3316_v41, %v4115_v12  ;;  %v459_v48 = vsub.f32 1.0, %v447_v26  ;;  %v1032_v49 = vpack.i.b16 %v767_v37, %v767_v37 }
  0xce   : > { %v1025_v51 = vpack.i.b16 %v763_v39, %v763_v39  ;;  %v472_v53 = vmax.f32 %v460_v28, 0.0  ;;  %v457_v13 = vsub.f32 1.0, %v445_v30  ;;  %v470_v42 = vmax.f32 %v458_v31, 0.0 }
  0xcf   : > { %v4180_v36 = vrot.slane %v686_v27, %v4115_v12  ;;  %v895_v54 = vrot.slane %v3325_v47, %v4078_v29  ;;  %v595_v55 = vcombine.high %v4132_v38, %v4132_v38  ;;  %v4190_v56 = vpack.c.bf16 %v464_v15, %v4124_v23 }
  0xd0   : > { %v1037_v57 = vrot.slane %v1032_v49, %v4112_v10  ;;  %v1030_v58 = vrot.slane %v1025_v51, %v4112_v10  ;;  %v467_v60 = vmax.f32 %v455_v40, 0.0  ;;  %v465_v33 = vmax.f32 %v453_v46, 0.0 }
  0xd1   : > { %v1256_v34 = vpack.i.b16 %v895_v54, %v895_v54  ;;  %v4194_v61 = vpack.c.bf16 %v468_v45, %v466_v32  ;;  %v471_v63 = vmax.f32 %v459_v48, 0.0  ;;  %v469_v2 = vmax.f32 %v457_v13, 0.0 }
  0xd2   : > { %v1487_v43 = vmul.bf16 %v1037_v57, %v4190_v56  ;;  %v1486_v62 = vmul.bf16 %v1030_v58, %v4177_v35  ;;  %v4198_v3 = vpack.c.bf16 %v472_v53, %v470_v42  ;;  %v4202_v38 = vrot.slane %v595_v55, %v4115_v12 }
  0xd3   : > { %v1261_v23 = vrot.slane %v1256_v34, %v4112_v10  ;;  %v1489_v4 = vmul.bf16 %v1037_v57, %v4194_v61  ;;  %v891_v5 = vrot.slane %v3325_v47, %v4112_v10  ;;  %v695_v6 = vunpack.i.h.s16 %v4142_v59 }
  0xd4   : > { %2314 = vmatprep.subr.bf16.mxu1 %v1487_v43  ;;  %v4207_v7 = vpack.c.bf16 %v467_v60, %v465_v33  ;;  %v711_v9 = vunpack.i.h.s16 %v4168_v52  ;;  %v645_v11 = vcombine.high %v4150_v1, %v4150_v1  ;;  %v4213_v41 = vpack.c.bf16 %v471_v63, %v469_v2 }
  0xd5   : > { %2315 = vmatpush1.bf16.msra.mxu1 %v1486_v62  ;;  %v1583_v8 = vmul.bf16 %v1261_v23, %v4190_v56  ;;  %v1249_v16 = vpack.i.b16 %v891_v5, %v891_v5  ;;  %v728_v17 = vpack.i.b16 %v695_v6, %v695_v6  ;;  %v1491_v21 = vmul.bf16 %v1037_v57, %v4198_v3 }
  0xd6   : > { %2316 = vmatprep.subr.bf16.mxu1 %v1489_v4  ;;  %v1488_v19 = vmul.bf16 %v1030_v58, %v4207_v7  ;;  %v744_v25 = vpack.i.b16 %v711_v9, %v711_v9  ;;  %v3318_v1 = vpack.i.b16 %v4202_v38, %v4202_v38  ;;  %v4226_v39 = vrot.slane %v645_v11, %v4115_v12 }
  0xd7   : > { %2647 = vmatprep.subr.bf16.mxu0 %v1583_v8  ;;  %v1254_v26 = vrot.slane %v1249_v16, %v4112_v10  ;;  %v775_v27 = vrot.slane %v728_v17, %v4078_v29  ;;  %v771_v24 = vrot.slane %v728_v17, %v4112_v10  ;;  %v1585_v40 = vmul.bf16 %v1261_v23, %v4194_v61 }
  0xd8   : > { %v903_v15 = vrot.slane %v744_v25, %v4078_v29  ;;  %v899_v37 = vrot.slane %v744_v25, %v4112_v10  ;;  %v1490_v45 = vmul.bf16 %v1030_v58, %v4213_v41  ;;  %v783_v48 = vrot.slane %v3318_v1, %v4078_v29 }
  0xd9   : > { %2317 = vmatpush1.bf16.msra.mxu1 %v1488_v19  ;;  %v1582_v28 = vmul.bf16 %v1254_v26, %v4177_v35  ;;  %v1046_v30 = vpack.i.b16 %v775_v27, %v775_v27  ;;  %v1039_v31 = vpack.i.b16 %v771_v24, %v771_v24  ;;  %v1584_v49 = vmul.bf16 %v1254_v26, %v4207_v7 }
  0xda   : > { %2318 = vmatprep.subr.bf16.mxu1 %v1491_v21  ;;  %v1270_v46 = vpack.i.b16 %v903_v15, %v903_v15  ;;  %v1587_v12 = vmul.bf16 %v1261_v23, %v4198_v3  ;;  %v1263_v53 = vpack.i.b16 %v899_v37, %v899_v37  ;;  %v779_v54 = vrot.slane %v3318_v1, %v4112_v10 }
  0xdb   : > { %2648 = vmatpush1.bf16.msra.mxu0 %v1582_v28  ;;  %v1051_v47 = vrot.slane %v1046_v30, %v4112_v10  ;;  %v1044_v32 = vrot.slane %v1039_v31, %v4112_v10  ;;  %v3326_v55 = vpack.i.b16 %v4226_v39, %v4226_v39  ;;  %v1060_v58 = vpack.i.b16 %v783_v48, %v783_v48 }
  0xdc   : > { %2649 = vmatprep.subr.bf16.mxu0 %v1585_v40  ;;  %v1275_v42 = vrot.slane %v1270_v46, %v4112_v10  ;;  %v697_v60 = vunpack.i.h.s16 %v4202_v38  ;;  %v1586_v33 = vmul.bf16 %v1254_v26, %v4213_v41  ;;  %v1268_v34 = vrot.slane %v1263_v53, %v4112_v10 }
  0xdd   : > { %2319 = vmatpush1.bf16.msra.mxu1 %v1490_v45  ;;  %v1493_v51 = vmul.bf16 %v1051_v47, %v4190_v56  ;;  %v1492_v13 = vmul.bf16 %v1044_v32, %v4177_v35  ;;  %v1495_v57 = vmul.bf16 %v1051_v47, %v4194_v61  ;;  %v1494_v62 = vmul.bf16 %v1044_v32, %v4207_v7 }
  0xde   : > { %v1589_v43 = vmul.bf16 %v1275_v42, %v4190_v56  ;;  %v1053_v63 = vpack.i.b16 %v779_v54, %v779_v54  ;;  %v911_v2 = vrot.slane %v3326_v55, %v4078_v29  ;;  %v1497_v23 = vmul.bf16 %v1051_v47, %v4198_v3 }
  0xdf   : > { %2650 = vmatpush1.bf16.msra.mxu0 %v1584_v49  ;;  %2320 = vmatprep.subr.bf16.mxu1 %v1493_v51  ;;  %v1065_v4 = vrot.slane %v1060_v58, %v4112_v10  ;;  %v730_v5 = vpack.i.b16 %v697_v60, %v697_v60  ;;  %v1588_v6 = vmul.bf16 %v1268_v34, %v4177_v35  ;;  %v713_v9 = vunpack.i.h.s16 %v4226_v39 }
  0xe0   : > { %2651 = vmatprep.subr.bf16.mxu0 %v1587_v12  ;;  %v907_v8 = vrot.slane %v3326_v55, %v4112_v10  ;;  %v1591_v11 = vmul.bf16 %v1275_v42, %v4194_v61  ;;  %v1496_v16 = vmul.bf16 %v1044_v32, %v4213_v41  ;;  %v1058_v17 = vrot.slane %v1053_v63, %v4112_v10 }
  0xe1   : > { %2321 = vmatpush1.bf16.msra.mxu1 %v1492_v13  ;;  %v1284_v19 = vpack.i.b16 %v911_v2, %v911_v2  ;;  %v1499_v21 = vmul.bf16 %v1065_v4, %v4190_v56  ;;  %v791_v25 = vrot.slane %v730_v5, %v4078_v29  ;;  %v1590_v26 = vmul.bf16 %v1268_v34, %v4207_v7 }
  0xe2   : > { %2322 = vmatprep.subr.bf16.mxu1 %v1495_v57  ;;  %v1593_v27 = vmul.bf16 %v1275_v42, %v4198_v3  ;;  %v1277_v24 = vpack.i.b16 %v907_v8, %v907_v8  ;;  %v1498_v1 = vmul.bf16 %v1058_v17, %v4177_v35  ;;  %v787_v28 = vrot.slane %v730_v5, %v4112_v10 }
  0xe3   : > { %2652 = vmatpush1.bf16.msra.mxu0 %v1586_v33  ;;  %v1289_v15 = vrot.slane %v1284_v19, %v4112_v10  ;;  %v746_v30 = vpack.i.b16 %v713_v9, %v713_v9  ;;  %v625_v31 = vcombine.high %v4142_v59, %v4142_v59  ;;  %v1501_v37 = vmul.bf16 %v1065_v4, %v4194_v61 }
  0xe4   : > { %2653 = vmatprep.subr.bf16.mxu0 %v1589_v43  ;;  %v1074_v40 = vpack.i.b16 %v791_v25, %v791_v25  ;;  %v1592_v45 = vmul.bf16 %v1268_v34, %v4213_v41  ;;  %v1282_v46 = vrot.slane %v1277_v24, %v4112_v10  ;;  %v1500_v32 = vmul.bf16 %v1058_v17, %v4207_v7 }
  0xe5   : > { %2323 = vmatpush1.bf16.msra.mxu1 %v1494_v62  ;;  %v1595_v47 = vmul.bf16 %v1289_v15, %v4190_v56  ;;  %v1067_v48 = vpack.i.b16 %v787_v28, %v787_v28  ;;  %v919_v49 = vrot.slane %v746_v30, %v4078_v29  ;;  %v1503_v59 = vmul.bf16 %v1065_v4, %v4198_v3 }
  0xe6   : > { %2324 = vmatprep.subr.bf16.mxu1 %v1497_v23  ;;  %v1079_v51 = vrot.slane %v1074_v40, %v4112_v10  ;;  %v3319_v12 = vpack.i.b16 %v625_v31, %v625_v31  ;;  %v675_v53 = vcombine.high %v4168_v52, %v4168_v52  ;;  %v1594_v13 = vmul.bf16 %v1282_v46, %v4177_v35 }
  0xe7   : > { %2654 = vmatpush1.bf16.msra.mxu0 %v1588_v6  ;;  %v915_v42 = vrot.slane %v746_v30, %v4112_v10  ;;  %v1597_v54 = vmul.bf16 %v1289_v15, %v4194_v61  ;;  %v1502_v55 = vmul.bf16 %v1058_v17, %v4213_v41  ;;  %v1072_v57 = vrot.slane %v1067_v48, %v4112_v10 }
  0xe8   : > { %2655 = vmatprep.subr.bf16.mxu0 %v1591_v11  ;;  %v1298_v58 = vpack.i.b16 %v919_v49, %v919_v49  ;;  %v1505_v60 = vmul.bf16 %v1079_v51, %v4190_v56  ;;  %v799_v33 = vrot.slane %v3319_v12, %v4078_v29  ;;  %v1596_v52 = vmul.bf16 %v1282_v46, %v4207_v7 }
  0xe9   : > { %2325 = vmatpush1.bf16.msra.mxu1 %v1496_v16  ;;  %v1599_v34 = vmul.bf16 %v1289_v15, %v4198_v3  ;;  %v1291_v43 = vpack.i.b16 %v915_v42, %v915_v42  ;;  %v1504_v62 = vmul.bf16 %v1072_v57, %v4177_v35  ;;  %v795_v2 = vrot.slane %v3319_v12, %v4112_v10 }
  0xea   : > { %2326 = vmatprep.subr.bf16.mxu1 %v1499_v21  ;;  %v1303_v63 = vrot.slane %v1298_v58, %v4112_v10  ;;  %v3327_v23 = vpack.i.b16 %v675_v53, %v675_v53  ;;  %v1507_v4 = vmul.bf16 %v1079_v51, %v4194_v61  ;;  %v1088_v5 = vpack.i.b16 %v799_v33, %v799_v33 }
  0xeb   : > { %2656 = vmatpush1.bf16.msra.mxu0 %v1590_v26  ;;  %v699_v6 = vunpack.i.h.s16 %v625_v31  ;;  %v1598_v8 = vmul.bf16 %v1282_v46, %v4213_v41  ;;  %v1296_v9 = vrot.slane %v1291_v43, %v4112_v10  ;;  %v1506_v16 = vmul.bf16 %v1072_v57, %v4207_v7 }
  0xec   : > { %2657 = vmatprep.subr.bf16.mxu0 %v1593_v27  ;;  %v1601_v11 = vmul.bf16 %v1303_v63, %v4190_v56  ;;  %v1081_v17 = vpack.i.b16 %v795_v2, %v795_v2  ;;  %v927_v19 = vrot.slane %v3327_v23, %v4078_v29  ;;  %v1509_v21 = vmul.bf16 %v1079_v51, %v4198_v3 }
  0xed   : > { %2327 = vmatpush1.bf16.msra.mxu1 %v1498_v1  ;;  %v1093_v25 = vrot.slane %v1088_v5, %v4112_v10  ;;  %v732_v26 = vpack.i.b16 %v699_v6, %v699_v6  ;;  %v1600_v27 = vmul.bf16 %v1296_v9, %v4177_v35  ;;  %v923_v24 = vrot.slane %v3327_v23, %v4112_v10 }
  0xee   : > { %2328 = vmatprep.subr.bf16.mxu1 %v1501_v37  ;;  %v715_v1 = vunpack.i.h.s16 %v675_v53  ;;  %v1603_v15 = vmul.bf16 %v1303_v63, %v4194_v61  ;;  %v1508_v28 = vmul.bf16 %v1072_v57, %v4213_v41  ;;  %v1086_v30 = vrot.slane %v1081_v17, %v4112_v10 }
  0xef   : > { %2658 = vmatpush1.bf16.msra.mxu0 %v1592_v45  ;;  %v1312_v31 = vpack.i.b16 %v927_v19, %v927_v19  ;;  %v1511_v37 = vmul.bf16 %v1093_v25, %v4190_v56  ;;  %v807_v40 = vrot.slane %v732_v26, %v4078_v29  ;;  %v1602_v45 = vmul.bf16 %v1296_v9, %v4207_v7 }
  0xf0   : > { %2659 = vmatprep.subr.bf16.mxu0 %v1595_v47  ;;  %v1605_v46 = vmul.bf16 %v1303_v63, %v4198_v3  ;;  %v1305_v47 = vpack.i.b16 %v923_v24, %v923_v24  ;;  %v803_v49 = vrot.slane %v732_v26, %v4112_v10  ;;  %v1513_v51 = vmul.bf16 %v1093_v25, %v4194_v61 }
  0xf1   : > { %2329 = vmatpush1.bf16.msra.mxu1 %v1500_v32  ;;  %v1510_v32 = vmul.bf16 %v1086_v30, %v4177_v35  ;;  %v1317_v48 = vrot.slane %v1312_v31, %v4112_v10  ;;  %v1102_v12 = vpack.i.b16 %v807_v40, %v807_v40  ;;  %v627_v53 = vcombine.high %v4202_v38, %v4202_v38 }
  0xf2   : > { %2330 = vmatprep.subr.bf16.mxu1 %v1503_v59  ;;  %v748_v59 = vpack.i.b16 %v715_v1, %v715_v1  ;;  %v1310_v42 = vrot.slane %v1305_v47, %v4112_v10  ;;  %v1095_v57 = vpack.i.b16 %v803_v49, %v803_v49  ;;  %v4324_v23 = vcombine.high %v4226_v39, %v4226_v39  ;;  %v3715_v1 = vld [vmem:[#allocation2 + $0x6c] ss:$52 sps:$4 sm:$0xff]  }
  0xf3   : > { %2660 = vmatpush1.bf16.msra.mxu0 %v1594_v13  ;;  %v1604_v13 = vmul.bf16 %v1296_v9, %v4213_v41  ;;  %v1107_v33 = vrot.slane %v1102_v12, %v4112_v10  ;;  %v3320_v38 = vpack.i.b16 %v627_v53, %v627_v53  ;;  %v701_v26 = vunpack.i.h.s16 %v627_v53  ;;  %v3712_v49 = vld [vmem:[#allocation2 + $0x18] ss:$52 sps:$4 sm:$0xff]  }
  0xf4   : > { %2661 = vmatprep.subr.bf16.mxu0 %v1597_v54  ;;  %v1607_v54 = vmul.bf16 %v1317_v48, %v4190_v56  ;;  %v935_v58 = vrot.slane %v748_v59, %v4078_v29  ;;  %v931_v43 = vrot.slane %v748_v59, %v4112_v10  ;;  %v1100_v63 = vrot.slane %v1095_v57, %v4112_v10  ;;  %v3718_v57 = vld [vmem:[#allocation2 + $0x84] ss:$52 sps:$4 sm:$0xff]  }
  0xf5   : > { %2331 = vmatpush1.bf16.msra.mxu1 %v1502_v55  ;;  %v1512_v55 = vmul.bf16 %v1086_v30, %v4207_v7  ;;  %v815_v5 = vrot.slane %v3320_v38, %v4078_v29  ;;  %v1608_v6 = vmul.bf16 %v1310_v42, %v4207_v7  ;;  %v811_v39 = vrot.slane %v3320_v38, %v4112_v10  ;;  %v3721_v38 = vld [vmem:[#allocation2 + $0xd4] ss:$52 sps:$4 sm:$0xff]  }
  0xf6   : > { %2332 = vmatprep.subr.bf16.mxu1 %v1505_v60  ;;  %v1515_v60 = vmul.bf16 %v1093_v25, %v4198_v3  ;;  %v1326_v2 = vpack.i.b16 %v935_v58, %v935_v58  ;;  %v1319_v9 = vpack.i.b16 %v931_v43, %v931_v43  ;;  %v3328_v17 = vpack.i.b16 %v4324_v23, %v4324_v23 }
  0xf7   : > { %2662 = vmatpush1.bf16.msra.mxu0 %v1596_v52  ;;  %v1606_v52 = vmul.bf16 %v1310_v42, %v4177_v35  ;;  %v1519_v19 = vmul.bf16 %v1107_v33, %v4194_v61  ;;  %v1116_v25 = vpack.i.b16 %v815_v5, %v815_v5  ;;  %v1520_v59 = vmul.bf16 %v1100_v63, %v4213_v41 }
  0xf8   : > { %2663 = vmatprep.subr.bf16.mxu0 %v1599_v34  ;;  %v1514_v34 = vmul.bf16 %v1086_v30, %v4213_v41  ;;  %v1324_v24 = vrot.slane %v1319_v9, %v4112_v10  ;;  %v1109_v30 = vpack.i.b16 %v811_v39, %v811_v39  ;;  %v943_v31 = vrot.slane %v3328_v17, %v4078_v29 }
  0xf9   : > { %2333 = vmatpush1.bf16.msra.mxu1 %v1504_v62  ;;  %v1609_v62 = vmul.bf16 %v1317_v48, %v4194_v61  ;;  %v1121_v40 = vrot.slane %v1116_v25, %v4112_v10  ;;  %v939_v47 = vrot.slane %v3328_v17, %v4112_v10  ;;  %v3321_v39 = vpack.i.b16 %v4161_v14, %v4161_v14 }
  0xfa   : > { %2334 = vmatprep.subr.bf16.mxu1 %v1507_v4  ;;  %v1517_v4 = vmul.bf16 %v1107_v33, %v4190_v56  ;;  %v1340_v12 = vpack.i.b16 %v943_v31, %v943_v31 }
  0xfb   : > { %2664 = vmatpush1.bf16.msra.mxu0 %v1598_v8  ;;  %v1611_v8 = vmul.bf16 %v1317_v48, %v4198_v3  ;;  %v1523_v53 = vmul.bf16 %v1121_v40, %v4190_v56  ;;  %v1333_v58 = vpack.i.b16 %v939_v47, %v939_v47  ;;  %v1525_v43 = vmul.bf16 %v1121_v40, %v4194_v61 }
  0xfc   : > { %2665 = vmatprep.subr.bf16.mxu0 %v1601_v11  ;;  %v1516_v11 = vmul.bf16 %v1100_v63, %v4177_v35  ;;  %v1527_v9 = vmul.bf16 %v1121_v40, %v4198_v3  ;;  %v3726_v40 = vld [vmem:[#allocation2 + $0xe8] ss:$52 sps:$4 sm:$0xff]   ;;  %v827_v47 = vrot.slane %v3321_v39, %v4112_v10 }
  0xfd   : > { %2335 = vmatpush1.bf16.msra.mxu1 %v1506_v16  ;;  %v1331_v16 = vrot.slane %v1326_v2, %v4112_v10  ;;  %v1338_v2 = vrot.slane %v1333_v58, %v4112_v10 }
  0xfe   : > { %2336 = vmatprep.subr.bf16.mxu1 %v1509_v21  ;;  %v3709_v21 = vld [vmem:[#allocation2] ss:$52 sps:$4 sm:$0xff]  }
  0xff   : > { %2666 = vmatpush1.bf16.msra.mxu0 %v1600_v27  ;;  %v1610_v27 = vmul.bf16 %v1310_v42, %v4213_v41  ;;  %v1615_v48 = vmul.bf16 %v1331_v16, %v4194_v61  ;;  %v1618_v17 = vmul.bf16 %v1338_v2, %v4177_v35 }
 0x100   : > { %2667 = vmatprep.subr.bf16.mxu0 %v1603_v15  ;;  %v1613_v15 = vmul.bf16 %v1331_v16, %v4190_v56 }
 0x101   : > { %2337 = vmatpush1.bf16.msra.mxu1 %v1508_v28  ;;  %v1518_v28 = vmul.bf16 %v1100_v63, %v4207_v7  ;;  %v1616_v63 = vmul.bf16 %v1324_v24, %v4213_v41 }
 0x102   : > { %2338 = vmatprep.subr.bf16.mxu1 %v1511_v37  ;;  %v1521_v37 = vmul.bf16 %v1107_v33, %v4198_v3  ;;  %v1345_v33 = vrot.slane %v1340_v12, %v4112_v10  ;;  %v1622_v12 = vmul.bf16 %v1338_v2, %v4213_v41 }
 0x103   : > { %2668 = vmatpush1.bf16.msra.mxu0 %v1602_v45  ;;  %v734_v45 = vpack.i.b16 %v701_v26, %v701_v26 }
 0x104   : > { %2669 = vmatprep.subr.bf16.mxu0 %v1605_v46  ;;  %v1612_v46 = vmul.bf16 %v1324_v24, %v4177_v35  ;;  %v1621_v25 = vmul.bf16 %v1345_v33, %v4194_v61  ;;  %v1623_v31 = vmul.bf16 %v1345_v33, %v4198_v3 }
 0x105   : > { %2339 = vmatpush1.bf16.msra.mxu1 %v1510_v32  ;;  %v717_v32 = vunpack.i.h.s16 %v4324_v23  ;;  %v823_v42 = vrot.slane %v734_v45, %v4078_v29  ;;  %v1619_v23 = vmul.bf16 %v1345_v33, %v4190_v56 }
 0x106   : > { %2340 = vmatprep.subr.bf16.mxu1 %v1513_v51  ;;  %v1114_v51 = vrot.slane %v1109_v30, %v4112_v10  ;;  %v1620_v30 = vmul.bf16 %v1338_v2, %v4207_v7 }
 0x107   : > { %2670 = vmatpush1.bf16.msra.mxu0 %v1604_v13  ;;  %v3717_v13 = vld [vmem:[#allocation2 + $0x68] ss:$52 sps:$4 sm:$0xff]  }
 0x108   : > { %2671 = vmatprep.subr.bf16.mxu0 %v1607_v54  ;;  %v1614_v54 = vmul.bf16 %v1324_v24, %v4207_v7  ;;  %v1524_v5 = vmul.bf16 %v1114_v51, %v4207_v7  ;;  %v1526_v26 = vmul.bf16 %v1114_v51, %v4213_v41 }
 0x109   : > { %2341 = vmatpush1.bf16.msra.mxu1 %v1512_v55  ;;  %v1617_v55 = vmul.bf16 %v1331_v16, %v4198_v3 }
 0x10a   : > { %2342 = vmatprep.subr.bf16.mxu1 %v1515_v60  ;;  %v1522_v60 = vmul.bf16 %v1114_v51, %v4177_v35  ;;  %v703_v51 = vunpack.i.h.s16 %v4161_v14 }
 0x10b   : > { %2672 = vmatpush1.bf16.msra.mxu0 %v1606_v52  ;;  %v819_v52 = vrot.slane %v734_v45, %v4112_v10 }
 0x10c   : > { %2673 = vmatprep.subr.bf16.mxu0 %v1609_v62  ;;  %v1130_v62 = vpack.i.b16 %v823_v42, %v823_v42 }
 0x10d   : > { %2343 = vmatpush1.bf16.msra.mxu1 %v1514_v34  ;;  %v750_v34 = vpack.i.b16 %v717_v32, %v717_v32  ;;  %v3329_v32 = vpack.i.b16 %v4158_v44, %v4158_v44 }
 0x10e   : > { %2344 = vmatprep.subr.bf16.mxu1 %v1517_v4  ;;  %v3720_v4 = vld [vmem:[#allocation2 + $0x80] ss:$52 sps:$4 sm:$0xff]   ;;  %v1135_v16 = vrot.slane %v1130_v62, %v4112_v10 }
 0x10f   : > { %2674 = vmatpush1.bf16.msra.mxu0 %v1608_v6  ;;  %v1123_v6 = vpack.i.b16 %v819_v52, %v819_v52  ;;  %v959_v58 = vrot.slane %v3329_v32, %v4078_v29 }
 0x110   : > { %2675 = vmatprep.subr.bf16.mxu0 %v1611_v8  ;;  %v951_v8 = vrot.slane %v750_v34, %v4078_v29 }
 0x111   : > { %2345 = vmatpush1.bf16.msra.mxu1 %v1516_v11  ;;  %v3723_v11 = vld [vmem:[#allocation2 + $0xd0] ss:$52 sps:$4 sm:$0xff]  }
 0x112   : > { %2425 = vmatprep.subr.bf16.mxu1 %v1519_v19  ;;  %v3724_v19 = vld [vmem:[#allocation2 + $0xec] ss:$52 sps:$4 sm:$0xff]   ;;  %v1354_v24 = vpack.i.b16 %v951_v8, %v951_v8 }
 0x113   : > { %2676 = vmatpush1.bf16.msra.mxu0 %v1610_v27  ;;  %v1128_v27 = vrot.slane %v1123_v6, %v4112_v10  ;;  %v3735_v6 = vld [vmem:[#allocation2 + $0x1a0] ss:$52 sps:$4 sm:$0xff]  }
 0x114   : > { %2347 = vmatmul.mubr.bf16.vlgmr.msra.gmra.mrb[0].mxu1 %v3709_v21  ;;  %2677 = vmatprep.subr.bf16.mxu0 %v1613_v15  ;;  %v947_v21 = vrot.slane %v750_v34, %v4112_v10  ;;  %v1529_v15 = vmul.bf16 %v1135_v16, %v4190_v56  ;;  %v955_v34 = vrot.slane %v3329_v32, %v4112_v10 }
 0x115   : > { %2426 = vmatpush1.bf16.msra.mxu1 %v1518_v28  ;;  %2356 = vmatprep.mubr.bf16.mxu1 %v3715_v1  ;;  %v3727_v1 = vld [vmem:[#allocation2 + $0x13c] ss:$52 sps:$4 sm:$0xff]   ;;  %v831_v28 = vrot.slane %v3321_v39, %v4078_v29  ;;  %v1528_v45 = vmul.bf16 %v1128_v27, %v4177_v35  ;;  %v1532_v2 = vmul.bf16 %v1128_v27, %v4213_v41 }
 0x116   : > { %2427 = vmatprep.subr.bf16.mxu1 %v1521_v37  ;;  %v1347_v37 = vpack.i.b16 %v947_v21, %v947_v21  ;;  %v1361_v39 = vpack.i.b16 %v955_v34, %v955_v34  ;;  %v3739_v21 = vld [vmem:[#allocation2 + $0x20c] ss:$52 sps:$4 sm:$0xff]   ;;  %v3322_v32 = vpack.i.b16 %v4171_v22, %v4171_v22  ;;  %v1782_v34 = vld [vmem:[#allocation2 + $0x2d8] sm:$0xff] }
 0x117   : > { %2678 = vmatpush1.bf16.msra.mxu0 %v1612_v46  ;;  %v1359_v46 = vrot.slane %v1354_v24, %v4112_v10 }
 0x118   : > { %2758 = vmatprep.subr.bf16.mxu0 %v1615_v48  ;;  %v1531_v48 = vmul.bf16 %v1135_v16, %v4194_v61 }
 0x119   : > { %2428 = vmatpush1.bf16.msra.mxu1 %v1520_v59  ;;  %v1144_v59 = vpack.i.b16 %v831_v28, %v831_v28  ;;  %v1625_v42 = vmul.bf16 %v1359_v46, %v4190_v56  ;;  %v1627_v62 = vmul.bf16 %v1359_v46, %v4194_v61 }
 0x11a   : > { %2429 = vmatprep.subr.bf16.mxu1 %v1523_v53  ;;  %2680 = vmatmul.mubr.bf16.vlgmr.msra.gmra.mrb[0].mxu0 %v3712_v49  ;;  %v3729_v49 = vld [vmem:[#allocation2 + $0x138] ss:$52 sps:$4 sm:$0xff]   ;;  %v1352_v53 = vrot.slane %v1347_v37, %v4112_v10 }
 0x11b   : > { %2759 = vmatpush1.bf16.msra.mxu0 %v1614_v54  ;;  %2689 = vmatprep.mubr.bf16.mxu0 %v3718_v57  ;;  %v1530_v54 = vmul.bf16 %v1128_v27, %v4207_v7  ;;  %v1137_v57 = vpack.i.b16 %v827_v47, %v827_v47  ;;  %v1149_v33 = vrot.slane %v1144_v59, %v4112_v10 }
 0x11c   : > { %2357 = vmatmul.mubr.bf16.gmra.mrb[4].mxu1 %v3717_v13  ;;  %2760 = vmatprep.subr.bf16.mxu0 %v1617_v55  ;;  %v3730_v13 = vld [vmem:[#allocation2 + $0x154] ss:$52 sps:$4 sm:$0xff]   ;;  %v3733_v55 = vld [vmem:[#allocation2 + $0x1a4] ss:$52 sps:$4 sm:$0xff]   ;;  %v1624_v52 = vmul.bf16 %v1352_v53, %v4177_v35 }
 0x11d   : > { %2430 = vmatpush1.bf16.msra.mxu1 %v1522_v60  ;;  %2366 = vmatprep.mubr.bf16.mxu1 %v3721_v38  ;;  %v1533_v60 = vmul.bf16 %v1135_v16, %v4198_v3  ;;  %v736_v38 = vpack.i.b16 %v703_v51, %v703_v51  ;;  %v3736_v16 = vld [vmem:[#allocation2 + $0x1bc] ss:$52 sps:$4 sm:$0xff]   ;;  %v1537_v27 = vmul.bf16 %v1149_v33, %v4194_v61 }
 0x11e   : > { %2431 = vmatprep.subr.bf16.mxu1 %v1525_v43  ;;  %v719_v43 = vunpack.i.h.s16 %v4158_v44 }
 0x11f   : > { %2761 = vmatpush1.bf16.msra.mxu0 %v1616_v63  ;;  %v3732_v63 = vld [vmem:[#allocation2 + $0x150] ss:$52 sps:$4 sm:$0xff]   ;;  %v839_v8 = vrot.slane %v736_v38, %v4078_v29 }
 0x120   : > { %2762 = vmatprep.subr.bf16.mxu0 %v1619_v23  ;;  %v1142_v23 = vrot.slane %v1137_v57, %v4112_v10 }
 0x121   : > { %2432 = vmatpush1.bf16.msra.mxu1 %v1524_v5  ;;  %v1535_v5 = vmul.bf16 %v1149_v33, %v4190_v56  ;;  %v1158_v24 = vpack.i.b16 %v839_v8, %v839_v8  ;;  %v3748_v8 = vld [vmem:[#allocation2 + $0x28c] ss:$52 sps:$4 sm:$0xff]  }
 0x122   : > { %2433 = vmatprep.subr.bf16.mxu1 %v1527_v9  ;;  %2690 = vmatmul.mubr.bf16.gmra.mrb[4].mxu0 %v3720_v4  ;;  %v1368_v4 = vpack.i.b16 %v959_v58, %v959_v58  ;;  %v1626_v9 = vmul.bf16 %v1352_v53, %v4207_v7 }
 0x123   : > { %2763 = vmatpush1.bf16.msra.mxu0 %v1618_v17  ;;  %2699 = vmatprep.mubr.bf16.mxu0 %v3724_v19  ;;  %v1534_v17 = vmul.bf16 %v1142_v23, %v4177_v35  ;;  %v1163_v47 = vrot.slane %v1158_v24, %v4112_v10  ;;  %v721_v24 = vunpack.i.h.s16 %v4164_v50 }
 0x124   : > { %2367 = vmatmul.mubr.bf16.gmra.mrb[8].mxu1 %v3723_v11  ;;  %2764 = vmatprep.subr.bf16.mxu0 %v1621_v25  ;;  %v1629_v11 = vmul.bf16 %v1359_v46, %v4198_v3  ;;  %v1373_v19 = vrot.slane %v1368_v4, %v4112_v10  ;;  %v835_v25 = vrot.slane %v736_v38, %v4112_v10  ;;  %v3741_v46 = vld [vmem:[#allocation2 + $0x208] ss:$52 sps:$4 sm:$0xff]   ;;  %v705_v4 = vunpack.i.h.s16 %v4171_v22 }
 0x125   : > { %2434 = vmatpush1.bf16.msra.mxu1 %v1526_v26  ;;  %2376 = vmatprep.mubr.bf16.mxu1 %v3727_v1  ;;  %v752_v26 = vpack.i.b16 %v719_v43, %v719_v43  ;;  %v1628_v1 = vmul.bf16 %v1352_v53, %v4213_v41  ;;  %v843_v43 = vrot.slane %v3322_v32, %v4112_v10 }
 0x126   : > { %2435 = vmatprep.subr.bf16.mxu1 %v1529_v15  ;;  %v1366_v15 = vrot.slane %v1361_v39, %v4112_v10  ;;  %v1631_v28 = vmul.bf16 %v1373_v19, %v4190_v56  ;;  %v1151_v37 = vpack.i.b16 %v835_v25, %v835_v25  ;;  %v1633_v51 = vmul.bf16 %v1373_v19, %v4194_v61 }
 0x127   : > { %2765 = vmatpush1.bf16.msra.mxu0 %v1620_v30  ;;  %v3738_v30 = vld [vmem:[#allocation2 + $0x1b8] ss:$52 sps:$4 sm:$0xff]   ;;  %v963_v59 = vrot.slane %v752_v26, %v4112_v10  ;;  %v1635_v58 = vmul.bf16 %v1373_v19, %v4198_v3  ;;  %v1165_v39 = vpack.i.b16 %v843_v43, %v843_v43  ;;  %v1545_v19 = vmul.bf16 %v1163_v47, %v4198_v3  ;;  %v3755_v43 = vld [vmem:[#allocation2 + $0x8] ss:$52 sps:$4 sm:$0xff]  }
 0x128   : > { %2766 = vmatprep.subr.bf16.mxu0 %v1623_v31  ;;  %v1536_v31 = vmul.bf16 %v1142_v23, %v4207_v7  ;;  %v1156_v53 = vrot.slane %v1151_v37, %v4112_v10  ;;  %v1632_v57 = vmul.bf16 %v1366_v15, %v4207_v7  ;;  %v738_v25 = vpack.i.b16 %v705_v4, %v705_v4  ;;  %v1785_v37 = vld [vmem:[#allocation2 + $0x2f0] sm:$0xff]  ;;  %v3760_v4 = vld [vmem:[#allocation2 + $0x24] ss:$52 sps:$4 sm:$0xff]  }
 0x129   : > { %2436 = vmatpush1.bf16.msra.mxu1 %v1528_v45  ;;  %v1539_v45 = vmul.bf16 %v1149_v33, %v4198_v3  ;;  %v3744_v33 = vld [vmem:[#allocation2 + $0x220] ss:$52 sps:$4 sm:$0xff]  }
 0x12a   : > { %2437 = vmatprep.subr.bf16.mxu1 %v1531_v48  ;;  %2700 = vmatmul.mubr.bf16.gmra.mrb[8].mxu0 %v3726_v40  ;;  %v967_v40 = vrot.slane %v752_v26, %v4078_v29  ;;  %v1630_v48 = vmul.bf16 %v1366_v15, %v4177_v35  ;;  %v1540_v38 = vmul.bf16 %v1156_v53, %v4177_v35 }
 0x12b   : > { %2767 = vmatpush1.bf16.msra.mxu0 %v1622_v12  ;;  %2709 = vmatprep.mubr.bf16.mxu0 %v3730_v13  ;;  %v1538_v12 = vmul.bf16 %v1142_v23, %v4213_v41 }
 0x12c   : > { %2377 = vmatmul.mubr.bf16.gmra.mrb[12].mxu1 %v3729_v49  ;;  %2768 = vmatprep.subr.bf16.mxu0 %v1625_v42  ;;  %v3742_v49 = vld [vmem:[#allocation2 + $0x224] ss:$52 sps:$4 sm:$0xff]   ;;  %v1382_v13 = vpack.i.b16 %v967_v40, %v967_v40  ;;  %v3745_v42 = vld [vmem:[#allocation2 + $0x274] ss:$52 sps:$4 sm:$0xff]  }
 0x12d   : > { %2438 = vmatpush1.bf16.msra.mxu1 %v1530_v54  ;;  %2386 = vmatprep.mubr.bf16.mxu1 %v3733_v55  ;;  %v1541_v54 = vmul.bf16 %v1163_v47, %v4190_v56  ;;  %v847_v55 = vrot.slane %v3322_v32, %v4078_v29 }
 0x12e   : > { %2439 = vmatprep.subr.bf16.mxu1 %v1533_v60  ;;  %v1375_v60 = vpack.i.b16 %v963_v59, %v963_v59 }
 0x12f   : > { %2769 = vmatpush1.bf16.msra.mxu0 %v1624_v52  ;;  %v4423_v52 = vrot.slane %v1382_v13, %v4112_v10  ;;  %v1172_v23 = vpack.i.b16 %v847_v55, %v847_v55  ;;  %v754_v13 = vpack.i.b16 %v721_v24, %v721_v24 }
 0x130   : > { %2770 = vmatprep.subr.bf16.mxu0 %v1627_v62  ;;  %v3330_v62 = vpack.i.b16 %v4164_v50, %v4164_v50 }
 0x131   : > { %2440 = vmatpush1.bf16.msra.mxu1 %v1532_v2  ;;  %v3747_v2 = vld [vmem:[#allocation2 + $0x270] ss:$52 sps:$4 sm:$0xff]   ;;  %v1641_v32 = vmul.bf16 %v4423_v52, %v4198_v3 }
 0x132   : > { %2441 = vmatprep.subr.bf16.mxu1 %v1535_v5  ;;  %2710 = vmatmul.mubr.bf16.gmra.mrb[12].mxu0 %v3732_v63  ;;  %v1543_v63 = vmul.bf16 %v1163_v47, %v4194_v61  ;;  %v1634_v5 = vmul.bf16 %v1366_v15, %v4213_v41  ;;  %v3750_v15 = vld [vmem:[#allocation2 + $0x288] ss:$52 sps:$4 sm:$0xff]  }
 0x133   : > { %2771 = vmatpush1.bf16.msra.mxu0 %v1626_v9  ;;  %2719 = vmatprep.mubr.bf16.mxu0 %v3736_v16  ;;  %v3426_v9 = vcombine.high %v1782_v34, %v1782_v34  ;;  %v1542_v16 = vmul.bf16 %v1156_v53, %v4207_v7 }
 0x134   : > { %2387 = vmatmul.mubr.bf16.gmra.mrb[16].mxu1 %v3735_v6  ;;  %2772 = vmatprep.subr.bf16.mxu0 %v1629_v11  ;;  %v1380_v6 = vrot.slane %v1375_v60, %v4112_v10  ;;  %v1637_v11 = vmul.bf16 %v4423_v52, %v4190_v56 }
 0x135   : > { %2442 = vmatpush1.bf16.msra.mxu1 %v1534_v17  ;;  %2396 = vmatprep.mubr.bf16.mxu1 %v3739_v21  ;;  %v975_v17 = vrot.slane %v3330_v62, %v4078_v29  ;;  %v1177_v21 = vrot.slane %v1172_v23, %v4112_v10 }
 0x136   : > { %2443 = vmatprep.subr.bf16.mxu1 %v1537_v27  ;;  %v1636_v26 = vmul.bf16 %v1380_v6, %v4177_v35  ;;  %v971_v27 = vrot.slane %v3330_v62, %v4112_v10  ;;  %v1638_v47 = vmul.bf16 %v1380_v6, %v4207_v7 }
 0x137   : > { %2773 = vmatpush1.bf16.msra.mxu0 %v1628_v1  ;;  %v1639_v1 = vmul.bf16 %v4423_v52, %v4194_v61  ;;  %v1547_v40 = vmul.bf16 %v1177_v21, %v4190_v56  ;;  %v983_v52 = vrot.slane %v754_v13, %v4078_v29 }
 0x138   : > { %2774 = vmatprep.subr.bf16.mxu0 %v1631_v28  ;;  %v1544_v28 = vmul.bf16 %v1156_v53, %v4213_v41  ;;  %v851_v53 = vrot.slane %v738_v25, %v4112_v10 }
 0x139   : > { %2444 = vmatpush1.bf16.msra.mxu1 %v1536_v31  ;;  %v1396_v31 = vpack.i.b16 %v975_v17, %v975_v17 }
 0x13a   : > { %2445 = vmatprep.subr.bf16.mxu1 %v1539_v45  ;;  %2720 = vmatmul.mubr.bf16.gmra.mrb[16].mxu0 %v3738_v30  ;;  %v1170_v30 = vrot.slane %v1165_v39, %v4112_v10  ;;  %v3425_v45 = vcombine.low %v1782_v34, %v1782_v34  ;;  %v1551_v34 = vmul.bf16 %v1177_v21, %v4198_v3 }
 0x13b   : > { %2775 = vmatpush1.bf16.msra.mxu0 %v1630_v48  ;;  %2729 = vmatprep.mubr.bf16.mxu0 %v3742_v49  ;;  %v3432_v48 = vcombine.high %v1785_v37, %v1785_v37  ;;  %v1389_v49 = vpack.i.b16 %v971_v27, %v971_v27 }
 0x13c   : > { %2397 = vmatmul.mubr.bf16.gmra.mrb[20].mxu1 %v3741_v46  ;;  %2776 = vmatprep.subr.bf16.mxu0 %v1633_v51  ;;  %v855_v46 = vrot.slane %v738_v25, %v4078_v29  ;;  %v1546_v59 = vmul.bf16 %v1170_v30, %v4177_v35  ;;  %v1401_v51 = vrot.slane %v1396_v31, %v4112_v10 }
 0x13d   : > { %2446 = vmatpush1.bf16.msra.mxu1 %v1538_v12  ;;  %2406 = vmatprep.mubr.bf16.mxu1 %v3745_v42  ;;  %v3757_v12 = vld [vmem:[#allocation2 + $0xc] ss:$52 sps:$4 sm:$0xff]   ;;  %v4455_v42 = vcombine.high %v4161_v14, %v4161_v14  ;;  %v1394_v60 = vrot.slane %v1389_v49, %v4112_v10  ;;  %v1179_v14 = vpack.i.b16 %v851_v53, %v851_v53 }
 0x13e   : > { %2447 = vmatprep.subr.bf16.mxu1 %v1541_v54  ;;  %v1549_v54 = vmul.bf16 %v1177_v21, %v4194_v61  ;;  %v1186_v55 = vpack.i.b16 %v855_v46, %v855_v46  ;;  %v4481_v25 = vmul.bf16 %v1401_v51, %v4198_v3 }
 0x13f   : > { %2777 = vmatpush1.bf16.msra.mxu0 %v1632_v57  ;;  %v1640_v57 = vmul.bf16 %v1380_v6, %v4213_v41  ;;  %v1642_v23 = vmul.bf16 %v1394_v60, %v4177_v35  ;;  %v1645_v6 = vmul.bf16 %v1401_v51, %v4194_v61  ;;  %v1644_v17 = vmul.bf16 %v1394_v60, %v4207_v7 }
 0x140   : > { %2778 = vmatprep.subr.bf16.mxu0 %v1635_v58  ;;  %v3431_v58 = vcombine.low %v1785_v37, %v1785_v37  ;;  %v1191_v62 = vrot.slane %v1186_v55, %v4112_v10  ;;  %v707_v31 = vunpack.i.h.s16 %v4455_v42  ;;  %v4491_v37 = vmul.bf16 %v1394_v60, %v4213_v41  ;;  %v3766_v55 = vld [vmem:[#allocation2 + $0x88] ss:$52 sps:$4 sm:$0xff]  }
 0x141   : > { %2448 = vmatpush1.bf16.msra.mxu1 %v1540_v38  ;;  %v1548_v38 = vmul.bf16 %v1170_v30, %v4207_v7 }
 0x142   : > { %2449 = vmatprep.subr.bf16.mxu1 %v1543_v63  ;;  %2730 = vmatmul.mubr.bf16.gmra.mrb[20].mxu0 %v3744_v33  ;;  %v1643_v33 = vmul.bf16 %v1401_v51, %v4190_v56  ;;  %v3323_v63 = vpack.i.b16 %v4455_v42, %v4455_v42 }
 0x143   : > { %2779 = vmatpush1.bf16.msra.mxu0 %v1634_v5  ;;  %2739 = vmatprep.mubr.bf16.mxu0 %v3748_v8  ;;  %v979_v5 = vrot.slane %v754_v13, %v4112_v10  ;;  %v1550_v8 = vmul.bf16 %v1170_v30, %v4213_v41 }
 0x144   : > { %2407 = vmatmul.mubr.bf16.gmra.mrb[24].mxu1 %v3747_v2  ;;  %2780 = vmatprep.subr.bf16.mxu0 %v1637_v11  ;;  %v4469_v2 = vcombine.high %v4158_v44, %v4158_v44  ;;  %v1410_v11 = vpack.i.b16 %v983_v52, %v983_v52  ;;  %v1553_v44 = vmul.bf16 %v1191_v62, %v4190_v56 }
 0x145   : > { %2450 = vmatpush1.bf16.msra.mxu1 %v1542_v16  ;;  %2416 = vmatprep.mubr.bf16.mxu1 %v3426_v9  ;;  %v1184_v9 = vrot.slane %v1179_v14, %v4112_v10  ;;  %v3761_v16 = vld [vmem:[#allocation2 + $0x74] ss:$52 sps:$4 sm:$0xff]   ;;  %v863_v39 = vrot.slane %v3323_v63, %v4078_v29  ;;  %v859_v21 = vrot.slane %v3323_v63, %v4112_v10 }
 0x146   : > { %2451 = vmatprep.subr.bf16.mxu1 %v1545_v19  ;;  %v1403_v19 = vpack.i.b16 %v979_v5, %v979_v5  ;;  %v1415_v24 = vrot.slane %v1410_v11, %v4112_v10  ;;  %v723_v42 = vunpack.i.h.s16 %v4469_v2 }
 0x147   : > { %2781 = vmatpush1.bf16.msra.mxu0 %v1636_v26  ;;  %v3758_v26 = vld [vmem:[#allocation2 + $0x20] ss:$52 sps:$4 sm:$0xff]   ;;  %v1552_v27 = vmul.bf16 %v1184_v9, %v4177_v35  ;;  %v1200_v30 = vpack.i.b16 %v863_v39, %v863_v39  ;;  %v3772_v39 = vld [vmem:[#allocation2 + $0xf0] ss:$52 sps:$4 sm:$0xff]  }
 0x148   : > { %2782 = vmatprep.subr.bf16.mxu0 %v1639_v1  ;;  %v3331_v1 = vpack.i.b16 %v4469_v2, %v4469_v2  ;;  %v4495_v46 = vmul.bf16 %v1415_v24, %v4190_v56  ;;  %v756_v5 = vpack.i.b16 %v723_v42, %v723_v42 }
 0x149   : > { %2452 = vmatpush1.bf16.msra.mxu1 %v1544_v28  ;;  %v3763_v28 = vld [vmem:[#allocation2 + $0x70] ss:$52 sps:$4 sm:$0xff]   ;;  %v1205_v51 = vrot.slane %v1200_v30, %v4112_v10 }
 0x14a   : > { %2453 = vmatprep.subr.bf16.mxu1 %v1547_v40  ;;  %2740 = vmatmul.mubr.bf16.gmra.mrb[24].mxu0 %v3750_v15  ;;  %v1555_v15 = vmul.bf16 %v1191_v62, %v4194_v61  ;;  %v1408_v40 = vrot.slane %v1403_v19, %v4112_v10  ;;  %v991_v49 = vrot.slane %v3331_v1, %v4078_v29 }
 0x14b   : > { %2783 = vmatpush1.bf16.msra.mxu0 %v1638_v47  ;;  %2749 = vmatprep.mubr.bf16.mxu0 %v3432_v48  ;;  %v1554_v47 = vmul.bf16 %v1184_v9, %v4207_v7  ;;  %v1193_v48 = vpack.i.b16 %v859_v21, %v859_v21  ;;  %v987_v13 = vrot.slane %v3331_v1, %v4112_v10 }
 0x14c   : > { %2417 = vmatmul.mubr.bf16.gmra.mrb[28].mxu1 %v3425_v45  ;;  %2784 = vmatprep.subr.bf16.mxu0 %v1641_v32  ;;  %v3764_v45 = vld [vmem:[#allocation2 + $0x8c] ss:$52 sps:$4 sm:$0xff]   ;;  %v3767_v32 = vld [vmem:[#allocation2 + $0xdc] ss:$52 sps:$4 sm:$0xff]   ;;  %v4504_v53 = vmul.bf16 %v1408_v40, %v4177_v35  ;;  %v1424_v60 = vpack.i.b16 %v991_v49, %v991_v49  ;;  %v4518_v52 = vmul.bf16 %v1408_v40, %v4207_v7 }
 0x14d   : > { %2454 = vmatpush1.bf16.msra.mxu1 %v1546_v59  ;;  %2457 = vmatprep.mubr.bf16.mxu1 %v3757_v12  ;;  %v1557_v59 = vmul.bf16 %v1191_v62, %v4198_v3  ;;  %v740_v12 = vpack.i.b16 %v707_v31, %v707_v31  ;;  %v1417_v62 = vpack.i.b16 %v987_v13, %v987_v13 }
 0x14e   : > { %2455 = vmatprep.subr.bf16.mxu1 %v1549_v54  ;;  %v4509_v54 = vmul.bf16 %v1415_v24, %v4194_v61  ;;  %v1429_v2 = vrot.slane %v1424_v60, %v4112_v10  ;;  %v4534_v11 = vmul.bf16 %v1408_v40, %v4213_v41  ;;  %v1563_v21 = vmul.bf16 %v1205_v51, %v4198_v3  ;;  %v3781_v60 = vld [vmem:[#allocation2 + $0x1a8] ss:$52 sps:$4 sm:$0xff]  }
 0x14f   : > { %2785 = vmatpush1.bf16.msra.mxu0 %v1640_v57  ;;  %v1556_v57 = vmul.bf16 %v1184_v9, %v4213_v41  ;;  %v871_v14 = vrot.slane %v740_v12, %v4078_v29  ;;  %v4530_v9 = vcombine.high %v4171_v22, %v4171_v22  ;;  %v999_v22 = vrot.slane %v756_v5, %v4078_v29 }
 0x150   : > { %2786 = vmatprep.subr.bf16.mxu0 %v1643_v33  ;;  %v1559_v33 = vmul.bf16 %v1205_v51, %v4190_v56  ;;  %v995_v30 = vrot.slane %v756_v5, %v4112_v10  ;;  %v4554_v31 = vmul.bf16 %v1429_v2, %v4194_v61 }
 0x151   : > { %2456 = vmatpush1.bf16.msra.mxu1 %v1548_v38  ;;  %v3769_v38 = vld [vmem:[#allocation2 + $0xd8] ss:$52 sps:$4 sm:$0xff]  }
 0x152   : > { %2536 = vmatprep.subr.bf16.mxu1 %v1551_v34  ;;  %2750 = vmatmul.mubr.bf16.gmra.mrb[28].mxu0 %v3431_v58  ;;  %v1198_v58 = vrot.slane %v1193_v48, %v4112_v10  ;;  %v4521_v34 = vmul.bf16 %v1415_v24, %v4198_v3  ;;  %v3324_v24 = vpack.i.b16 %v4530_v9, %v4530_v9 }
 0x153   : > { %2787 = vmatpush1.bf16.msra.mxu0 %v1642_v23  ;;  %2790 = vmatprep.mubr.bf16.mxu0 %v3760_v4  ;;  %v3773_v23 = vld [vmem:[#allocation2 + $0x144] ss:$52 sps:$4 sm:$0xff]   ;;  %v867_v4 = vrot.slane %v740_v12, %v4112_v10 }
 0x154   : > { %2458 = vmatmul.mubr.bf16.vlgmr.msra.gmra.mrb[0].mxu1 %v3755_v43  ;;  %2788 = vmatprep.subr.bf16.mxu0 %v1645_v6  ;;  %v3770_v43 = vld [vmem:[#allocation2 + $0xf4] ss:$52 sps:$4 sm:$0xff]   ;;  %v1558_v63 = vmul.bf16 %v1198_v58, %v4177_v35  ;;  %v1561_v6 = vmul.bf16 %v1205_v51, %v4194_v61  ;;  %v879_v49 = vrot.slane %v3324_v24, %v4078_v29  ;;  %v3778_v12 = vld [vmem:[#allocation2 + $0x158] ss:$52 sps:$4 sm:$0xff]  }
 0x155   : > { %2537 = vmatpush1.bf16.msra.mxu1 %v1550_v8  ;;  %2467 = vmatprep.mubr.bf16.mxu1 %v3761_v16  ;;  %v1214_v8 = vpack.i.b16 %v871_v14, %v871_v14  ;;  %v1422_v16 = vrot.slane %v1417_v62, %v4112_v10  ;;  %v1207_v19 = vpack.i.b16 %v867_v4, %v867_v4  ;;  %v3782_v62 = vld [vmem:[#allocation2 + $0x1c4] ss:$52 sps:$4 sm:$0xff]  }
 0x156   : > { %2538 = vmatprep.subr.bf16.mxu1 %v1553_v44  ;;  %v4538_v44 = vmul.bf16 %v1429_v2, %v4190_v56  ;;  %v4569_v51 = vmul.bf16 %v1429_v2, %v4198_v3 }
 0x157   : > { %2789 = vmatpush1.bf16.msra.mxu0 %v1644_v17  ;;  %v1560_v17 = vmul.bf16 %v1198_v58, %v4207_v7  ;;  %v4549_v1 = vmul.bf16 %v1422_v16, %v4177_v35  ;;  %v1212_v40 = vrot.slane %v1207_v19, %v4112_v10  ;;  %v4581_v14 = vmul.bf16 %v1422_v16, %v4213_v41 }
 0x158   : > { %2869 = vmatprep.subr.bf16.mxu0 %v4481_v25 }
 0x159   : > { %2539 = vmatpush1.bf16.msra.mxu1 %v1552_v27  ;;  %v1219_v27 = vrot.slane %v1214_v8, %v4112_v10  ;;  %v1564_v13 = vmul.bf16 %v1212_v40, %v4177_v35  ;;  %v1566_v2 = vmul.bf16 %v1212_v40, %v4207_v7 }
 0x15a   : > { %2540 = vmatprep.subr.bf16.mxu1 %v1555_v15  ;;  %2791 = vmatmul.mubr.bf16.vlgmr.msra.gmra.mrb[0].mxu0 %v3758_v26  ;;  %v3775_v26 = vld [vmem:[#allocation2 + $0x140] ss:$52 sps:$4 sm:$0xff]   ;;  %v1562_v15 = vmul.bf16 %v1198_v58, %v4213_v41 }
 0x15b   : > { %2870 = vmatpush1.bf16.msra.mxu0 %v4491_v37  ;;  %2800 = vmatprep.mubr.bf16.mxu0 %v3764_v45  ;;  %v1438_v45 = vpack.i.b16 %v999_v22, %v999_v22  ;;  %v1565_v48 = vmul.bf16 %v1219_v27, %v4190_v56  ;;  %v1567_v58 = vmul.bf16 %v1219_v27, %v4194_v61  ;;  %v3784_v22 = vld [vmem:[#allocation2 + $0x1c0] ss:$52 sps:$4 sm:$0xff]  }
 0x15c   : > { %2468 = vmatmul.mubr.bf16.gmra.mrb[4].mxu1 %v3763_v28  ;;  %2871 = vmatprep.subr.bf16.mxu0 %v4495_v46  ;;  %v3776_v28 = vld [vmem:[#allocation2 + $0x15c] ss:$52 sps:$4 sm:$0xff]  }
 0x15d   : > { %2541 = vmatpush1.bf16.msra.mxu1 %v1554_v47  ;;  %2477 = vmatprep.mubr.bf16.mxu1 %v3767_v32  ;;  %v3779_v47 = vld [vmem:[#allocation2 + $0x1ac] ss:$52 sps:$4 sm:$0xff]   ;;  %v4559_v32 = vcombine.high %v4164_v50, %v4164_v50  ;;  %v1431_v50 = vpack.i.b16 %v995_v30, %v995_v30  ;;  %v1443_v42 = vrot.slane %v1438_v45, %v4112_v10 }
 0x15e   : > { %2542 = vmatprep.subr.bf16.mxu1 %v1557_v59  ;;  %v4566_v59 = vmul.bf16 %v1422_v16, %v4207_v7  ;;  %v3788_v45 = vld [vmem:[#allocation2 + $0x22c] ss:$52 sps:$4 sm:$0xff]  }
 0x15f   : > { %2872 = vmatpush1.bf16.msra.mxu0 %v4504_v53  ;;  %v4599_v19 = vmul.bf16 %v1443_v42, %v4194_v61 }
 0x160   : > { %2873 = vmatprep.subr.bf16.mxu0 %v4509_v54 }
 0x161   : > { %2543 = vmatpush1.bf16.msra.mxu1 %v1556_v57  ;;  %v3332_v57 = vpack.i.b16 %v4559_v32, %v4559_v32 }
 0x162   : > { %2544 = vmatprep.subr.bf16.mxu1 %v1559_v33  ;;  %2801 = vmatmul.mubr.bf16.gmra.mrb[4].mxu0 %v3766_v55  ;;  %v875_v55 = vrot.slane %v3324_v24, %v4112_v10  ;;  %v1228_v33 = vpack.i.b16 %v879_v49, %v879_v49  ;;  %v3791_v49 = vld [vmem:[#allocation2 + $0x27c] ss:$52 sps:$4 sm:$0xff]  }
 0x163   : > { %2874 = vmatpush1.bf16.msra.mxu0 %v4518_v52  ;;  %2810 = vmatprep.mubr.bf16.mxu0 %v3770_v43  ;;  %v1436_v43 = vrot.slane %v1431_v50, %v4112_v10  ;;  %v1007_v5 = vrot.slane %v3332_v57, %v4078_v29 }
 0x164   : > { %2478 = vmatmul.mubr.bf16.gmra.mrb[8].mxu1 %v3769_v38  ;;  %2875 = vmatprep.subr.bf16.mxu0 %v4521_v34  ;;  %v709_v38 = vunpack.i.h.s16 %v4530_v9  ;;  %v1221_v4 = vpack.i.b16 %v875_v55, %v875_v55  ;;  %v1233_v8 = vrot.slane %v1228_v33, %v4112_v10 }
 0x165   : > { %2545 = vmatpush1.bf16.msra.mxu1 %v1558_v63  ;;  %2487 = vmatprep.mubr.bf16.mxu1 %v3773_v23  ;;  %v4585_v63 = vmul.bf16 %v1443_v42, %v4190_v56  ;;  %v3785_v23 = vld [vmem:[#allocation2 + $0x214] ss:$52 sps:$4 sm:$0xff]   ;;  %v4594_v16 = vmul.bf16 %v1436_v43, %v4177_v35  ;;  %v4608_v30 = vmul.bf16 %v1436_v43, %v4207_v7 }
 0x166   : > { %2546 = vmatprep.subr.bf16.mxu1 %v1561_v6  ;;  %v1569_v6 = vmul.bf16 %v1219_v27, %v4198_v3  ;;  %v742_v9 = vpack.i.b16 %v709_v38, %v709_v38  ;;  %v725_v27 = vunpack.i.h.s16 %v4559_v32  ;;  %v1571_v24 = vmul.bf16 %v1233_v8, %v4190_v56 }
 0x167   : > { %2876 = vmatpush1.bf16.msra.mxu0 %v4534_v11 }
 0x168   : > { %2877 = vmatprep.subr.bf16.mxu0 %v4538_v44  ;;  %v883_v50 = vrot.slane %v742_v9, %v4112_v10 }
 0x169   : > { %2547 = vmatpush1.bf16.msra.mxu1 %v1560_v17  ;;  %v1003_v17 = vrot.slane %v3332_v57, %v4112_v10 }
 0x16a   : > { %2548 = vmatprep.subr.bf16.mxu1 %v1563_v21  ;;  %2811 = vmatmul.mubr.bf16.gmra.mrb[8].mxu0 %v3772_v39  ;;  %v1568_v39 = vmul.bf16 %v1212_v40, %v4213_v41  ;;  %v1226_v21 = vrot.slane %v1221_v4, %v4112_v10  ;;  %v4611_v40 = vmul.bf16 %v1443_v42, %v4198_v3 }
 0x16b   : > { %2878 = vmatpush1.bf16.msra.mxu0 %v4549_v1  ;;  %2820 = vmatprep.mubr.bf16.mxu0 %v3776_v28  ;;  %v887_v28 = vrot.slane %v742_v9, %v4078_v29  ;;  %v4620_v42 = vmul.bf16 %v1436_v43, %v4213_v41  ;;  %v1235_v38 = vpack.i.b16 %v883_v50, %v883_v50 }
 0x16c   : > { %2488 = vmatmul.mubr.bf16.gmra.mrb[12].mxu1 %v3775_v26  ;;  %2879 = vmatprep.subr.bf16.mxu0 %v4554_v31  ;;  %v1452_v26 = vpack.i.b16 %v1007_v5, %v1007_v5  ;;  %v1570_v32 = vmul.bf16 %v1226_v21, %v4177_v35  ;;  %v1572_v33 = vmul.bf16 %v1226_v21, %v4207_v7 }
 0x16d   : > { %2549 = vmatpush1.bf16.msra.mxu1 %v1562_v15  ;;  %2497 = vmatprep.mubr.bf16.mxu1 %v3779_v47  ;;  %v3787_v15 = vld [vmem:[#allocation2 + $0x210] ss:$52 sps:$4 sm:$0xff]   ;;  %v1445_v47 = vpack.i.b16 %v1003_v17, %v1003_v17  ;;  %v1242_v55 = vpack.i.b16 %v887_v28, %v887_v28  ;;  %v1575_v43 = vmul.bf16 %v1233_v8, %v4198_v3 }
 0x16e   : > { %2550 = vmatprep.subr.bf16.mxu1 %v1565_v48  ;;  %v1457_v48 = vrot.slane %v1452_v26, %v4112_v10 }
 0x16f   : > { %2880 = vmatpush1.bf16.msra.mxu0 %v4566_v59  ;;  %v1450_v57 = vrot.slane %v1445_v47, %v4112_v10  ;;  %v1247_v4 = vrot.slane %v1242_v55, %v4112_v10 }
 0x170   : > { %2881 = vmatprep.subr.bf16.mxu0 %v4569_v51  ;;  %v4637_v17 = vmul.bf16 %v1457_v48, %v4194_v61  ;;  %v4650_v28 = vmul.bf16 %v1457_v48, %v4198_v3 }
 0x171   : > { %2551 = vmatpush1.bf16.msra.mxu1 %v1564_v13  ;;  %v1573_v13 = vmul.bf16 %v1233_v8, %v4194_v61  ;;  %v4633_v5 = vmul.bf16 %v1450_v57, %v4177_v35  ;;  %v1574_v8 = vmul.bf16 %v1226_v21, %v4213_v41  ;;  %v3333_v21 = vpack.i.b16 %v4180_v36, %v4180_v36 }
 0x172   : > { %2552 = vmatprep.subr.bf16.mxu1 %v1567_v58  ;;  %2821 = vmatmul.mubr.bf16.gmra.mrb[12].mxu0 %v3778_v12  ;;  %v758_v12 = vpack.i.b16 %v725_v27, %v725_v27  ;;  %v4624_v58 = vmul.bf16 %v1457_v48, %v4190_v56  ;;  %v1577_v27 = vmul.bf16 %v1247_v4, %v4190_v56 }
 0x173   : > { %2882 = vmatpush1.bf16.msra.mxu0 %v4581_v14  ;;  %2830 = vmatprep.mubr.bf16.mxu0 %v3782_v62  ;;  %v1579_v50 = vmul.bf16 %v1247_v4, %v4194_v61  ;;  %v4658_v36 = vmul.bf16 %v1450_v57, %v4213_v41 }
 0x174   : > { %2498 = vmatmul.mubr.bf16.gmra.mrb[16].mxu1 %v3781_v60  ;;  %2883 = vmatprep.subr.bf16.mxu0 %v4585_v63  ;;  %v3790_v60 = vld [vmem:[#allocation2 + $0x228] ss:$52 sps:$4 sm:$0xff]   ;;  %v1015_v62 = vrot.slane %v758_v12, %v4078_v29 }
 0x175   : > { %2553 = vmatpush1.bf16.msra.mxu1 %v1566_v2  ;;  %2507 = vmatprep.mubr.bf16.mxu1 %v3785_v23  ;;  %v1783_v2 = vld [vmem:[#allocation2 + $0x2e0] sm:$0xff]  ;;  %v3793_v23 = vld [vmem:[#allocation2 + $0x278] ss:$52 sps:$4 sm:$0xff]  }
 0x176   : > { %2554 = vmatprep.subr.bf16.mxu1 %v1569_v6  ;;  %v3794_v6 = vld [vmem:[#allocation2 + $0x294] ss:$52 sps:$4 sm:$0xff]   ;;  %v3428_v9 = vcombine.high %v1783_v2, %v1783_v2  ;;  %v1466_v26 = vpack.i.b16 %v1015_v62, %v1015_v62  ;;  %v1581_v62 = vmul.bf16 %v1247_v4, %v4198_v3  ;;  %v3801_v4 = vld [vmem:[#allocation2 + $0x10] ss:$52 sps:$4 sm:$0xff]  }
 0x177   : > { %2884 = vmatpush1.bf16.msra.mxu0 %v4594_v16 }
 0x178   : > { %2885 = vmatprep.subr.bf16.mxu0 %v4599_v19 }
 0x179   : > { %2555 = vmatpush1.bf16.msra.mxu1 %v1568_v39  ;;  %v1011_v39 = vrot.slane %v758_v12, %v4112_v10  ;;  %v3427_v12 = vcombine.low %v1783_v2, %v1783_v2 }
 0x17a   : > { %2556 = vmatprep.subr.bf16.mxu1 %v1571_v24  ;;  %2831 = vmatmul.mubr.bf16.gmra.mrb[16].mxu0 %v3784_v22  ;;  %v1240_v22 = vrot.slane %v1235_v38, %v4112_v10  ;;  %v4645_v24 = vmul.bf16 %v1450_v57, %v4207_v7  ;;  %v1023_v38 = vrot.slane %v3333_v21, %v4078_v29 }
 0x17b   : > { %2886 = vmatpush1.bf16.msra.mxu0 %v4608_v30  ;;  %2840 = vmatprep.mubr.bf16.mxu0 %v3788_v45  ;;  %v3796_v45 = vld [vmem:[#allocation2 + $0x290] ss:$52 sps:$4 sm:$0xff]   ;;  %v1019_v57 = vrot.slane %v3333_v21, %v4112_v10 }
 0x17c   : > { %2508 = vmatmul.mubr.bf16.gmra.mrb[20].mxu1 %v3787_v15  ;;  %2887 = vmatprep.subr.bf16.mxu0 %v4611_v40  ;;  %v1459_v15 = vpack.i.b16 %v1011_v39, %v1011_v39  ;;  %v1576_v47 = vmul.bf16 %v1240_v22, %v4177_v35  ;;  %v1580_v29 = vmul.bf16 %v1240_v22, %v4213_v41 }
 0x17d   : > { %2557 = vmatpush1.bf16.msra.mxu1 %v1570_v32  ;;  %2517 = vmatprep.mubr.bf16.mxu1 %v3791_v49  ;;  %v1471_v32 = vrot.slane %v1466_v26, %v4112_v10  ;;  %v1786_v49 = vld [vmem:[#allocation2 + $0x2f8] sm:$0xff] }
 0x17e   : > { %2558 = vmatprep.subr.bf16.mxu1 %v1573_v13  ;;  %v1464_v48 = vrot.slane %v1459_v15, %v4112_v10  ;;  %v3434_v13 = vcombine.high %v1786_v49, %v1786_v49 }
 0x17f   : > { %2888 = vmatpush1.bf16.msra.mxu0 %v4620_v42  ;;  %v4662_v55 = vmul.bf16 %v1471_v32, %v4190_v56  ;;  %v4684_v26 = vmul.bf16 %v1471_v32, %v4198_v3 }
 0x180   : > { %2889 = vmatprep.subr.bf16.mxu0 %v4624_v58  ;;  %v4671_v2 = vmul.bf16 %v1464_v48, %v4177_v35  ;;  %v4680_v39 = vmul.bf16 %v1464_v48, %v4207_v7  ;;  %v4691_v15 = vmul.bf16 %v1464_v48, %v4213_v41  ;;  %v3847_v48 = vld [vmem:[#allocation2 + $0x238] ss:$52 sps:$4 sm:$0xff]  }
 0x181   : > { %2559 = vmatpush1.bf16.msra.mxu1 %v1572_v33  ;;  %v3803_v33 = vld [vmem:[#allocation2 + $0x14] ss:$52 sps:$4 sm:$0xff]  }
 0x182   : > { %2560 = vmatprep.subr.bf16.mxu1 %v1575_v43  ;;  %2841 = vmatmul.mubr.bf16.gmra.mrb[20].mxu0 %v3790_v60  ;;  %v1578_v60 = vmul.bf16 %v1240_v22, %v4207_v7  ;;  %v4674_v43 = vmul.bf16 %v1471_v32, %v4194_v61  ;;  %v3810_v32 = vld [vmem:[#allocation2 + $0x94] ss:$52 sps:$4 sm:$0xff]  }
 0x183   : > { %2890 = vmatpush1.bf16.msra.mxu0 %v4633_v5  ;;  %2850 = vmatprep.mubr.bf16.mxu0 %v3794_v6  ;;  %v1480_v6 = vpack.i.b16 %v1023_v38, %v1023_v38  ;;  %v3854_v38 = vld [vmem:[#allocation2 + $0x308] ss:$0 sps:$4 sm:$0xff]  }
 0x184   : > { %2518 = vmatmul.mubr.bf16.gmra.mrb[24].mxu1 %v3793_v23  ;;  %2891 = vmatprep.subr.bf16.mxu0 %v4637_v17  ;;  %v3433_v23 = vcombine.low %v1786_v49, %v1786_v49  ;;  %v3813_v49 = vld [vmem:[#allocation2 + $0xe4] ss:$52 sps:$4 sm:$0xff]  }
 0x185   : > { %2561 = vmatpush1.bf16.msra.mxu1 %v1574_v8  ;;  %2527 = vmatprep.mubr.bf16.mxu1 %v3428_v9  ;;  %v1473_v9 = vpack.i.b16 %v1019_v57, %v1019_v57  ;;  %v3806_v8 = vld [vmem:[#allocation2 + $0x2c] ss:$52 sps:$4 sm:$0xff]   ;;  %v1485_v22 = vrot.slane %v1480_v6, %v4112_v10 }
 0x186   : > { %2562 = vmatprep.subr.bf16.mxu1 %v1577_v27  ;;  %v3807_v27 = vld [vmem:[#allocation2 + $0x7c] ss:$52 sps:$4 sm:$0xff]  }
 0x187   : > { %2892 = vmatpush1.bf16.msra.mxu0 %v4645_v24  ;;  %v1679_v21 = vmul.bf16 %v1485_v22, %v4190_v56 }
 0x188   : > { %2893 = vmatprep.subr.bf16.mxu0 %v4650_v28 }
 0x189   : > { %2563 = vmatpush1.bf16.msra.mxu1 %v1576_v47  ;;  %v3809_v47 = vld [vmem:[#allocation2 + $0x78] ss:$52 sps:$4 sm:$0xff]  }
 0x18a   : > { %2564 = vmatprep.subr.bf16.mxu1 %v1579_v50  ;;  %2851 = vmatmul.mubr.bf16.gmra.mrb[24].mxu0 %v3796_v45  ;;  %v3804_v45 = vld [vmem:[#allocation2 + $0x28] ss:$52 sps:$4 sm:$0xff]  }
 0x18b   : > { %2894 = vmatpush1.bf16.msra.mxu0 %v4658_v36  ;;  %2860 = vmatprep.mubr.bf16.mxu0 %v3434_v13  ;;  %v3850_v13 = vld [vmem:[#allocation2 + $0x298] ss:$52 sps:$4 sm:$0xff]  }
 0x18c   : > { %2528 = vmatmul.mubr.bf16.gmra.mrb[28].mxu1 %v3427_v12  ;;  %2895 = vmatprep.subr.bf16.mxu0 %v4662_v55  ;;  %v3848_v12 = vld [vmem:[#allocation2 + $0x29c] ss:$52 sps:$4 sm:$0xff]  }
 0x18d   : > { %2565 = vmatpush1.bf16.msra.mxu1 %v1578_v60  ;;  %2568 = vmatprep.mubr.bf16.mxu1 %v3803_v33  ;;  %v3851_v60 = vld [vmem:[#allocation2 + $0x2a0] ss:$52 sps:$4 sm:$0xff]  }
 0x18e   : > { %2566 = vmatprep.subr.bf16.mxu1 %v1581_v62 }
 0x18f   : > { %2896 = vmatpush1.bf16.msra.mxu0 %v4671_v2 }
 0x190   : > { %2897 = vmatprep.subr.bf16.mxu0 %v4674_v43 }
 0x191   : > { %2567 = vmatpush1.bf16.msra.mxu1 %v1580_v29 }
 0x192   : > { %3450 = vmatprep.subr.bf16.mxu1 %v4481_v25  ;;  %2861 = vmatmul.mubr.bf16.gmra.mrb[28].mxu0 %v3433_v23  ;;  %v1478_v25 = vrot.slane %v1473_v9, %v4112_v10 }
 0x193   : > { %2898 = vmatpush1.bf16.msra.mxu0 %v4680_v39  ;;  %2901 = vmatprep.mubr.bf16.mxu0 %v3806_v8 }
 0x194   : > { %2569 = vmatmul.mubr.bf16.vlgmr.msra.gmra.mrb[0].mxu1 %v3801_v4  ;;  %2899 = vmatprep.subr.bf16.mxu0 %v4684_v26  ;;  %v1680_v56 = vmul.bf16 %v1478_v25, %v4207_v7  ;;  %v1682_v50 = vmul.bf16 %v1478_v25, %v4213_v41  ;;  %v3821_v7 = vld [vmem:[#allocation2 + $0x148] ss:$52 sps:$4 sm:$0xff]   ;;  %v3824_v41 = vld [vmem:[#allocation2 + $0x160] ss:$52 sps:$4 sm:$0xff]  }
 0x195   : > { %3466 = vmatpush1.bf16.msra.mxu1 %v4491_v37  ;;  %2578 = vmatprep.mubr.bf16.mxu1 %v3807_v27  ;;  %v1678_v37 = vmul.bf16 %v1478_v25, %v4177_v35  ;;  %v3812_v35 = vld [vmem:[#allocation2 + $0x90] ss:$52 sps:$4 sm:$0xff]  }
 0x196   : > { %3451 = vmatprep.subr.bf16.mxu1 %v4495_v46  ;;  %v1681_v46 = vmul.bf16 %v1485_v22, %v4194_v61  ;;  %v3816_v61 = vld [vmem:[#allocation2 + $0xfc] ss:$52 sps:$4 sm:$0xff]  }
 0x197   : > { %2900 = vmatpush1.bf16.msra.mxu0 %v4691_v15 }
 0x198   : > { %2980 = vmatprep.subr.bf16.mxu0 %v1679_v21 }
 0x199   : > { %3467 = vmatpush1.bf16.msra.mxu1 %v4504_v53  ;;  %v1683_v53 = vmul.bf16 %v1485_v22, %v4198_v3  ;;  %v3818_v3 = vld [vmem:[#allocation2 + $0xf8] ss:$52 sps:$4 sm:$0xff]  }
 0x19a   : > { %3452 = vmatprep.subr.bf16.mxu1 %v4509_v54  ;;  %2902 = vmatmul.mubr.bf16.vlgmr.msra.gmra.mrb[0].mxu0 %v3804_v45  ;;  %v3815_v54 = vld [vmem:[#allocation2 + $0xe0] ss:$52 sps:$4 sm:$0xff]  }
 0x19b   : > { %2981 = vmatpush1.bf16.msra.mxu0 %v1678_v37  ;;  %2911 = vmatprep.mubr.bf16.mxu0 %v3810_v32 }
 0x19c   : > { %2579 = vmatmul.mubr.bf16.gmra.mrb[4].mxu1 %v3809_v47  ;;  %2982 = vmatprep.subr.bf16.mxu0 %v1681_v46 }
 0x19d   : > { %3468 = vmatpush1.bf16.msra.mxu1 %v4518_v52  ;;  %2588 = vmatprep.mubr.bf16.mxu1 %v3813_v49  ;;  %v3819_v52 = vld [vmem:[#allocation2 + $0x14c] ss:$52 sps:$4 sm:$0xff]  }
 0x19e   : > { %3453 = vmatprep.subr.bf16.mxu1 %v4521_v34  ;;  %v3822_v34 = vld [vmem:[#allocation2 + $0x164] ss:$52 sps:$4 sm:$0xff]  }
 0x19f   : > { %2983 = vmatpush1.bf16.msra.mxu0 %v1680_v56 }
 0x1a0   : > { %2984 = vmatprep.subr.bf16.mxu0 %v1683_v53 }
 0x1a1   : > { %3469 = vmatpush1.bf16.msra.mxu1 %v4534_v11  ;;  %v3825_v11 = vld [vmem:[#allocation2 + $0x1b4] ss:$52 sps:$4 sm:$0xff]  }
 0x1a2   : > { %3454 = vmatprep.subr.bf16.mxu1 %v4538_v44  ;;  %2912 = vmatmul.mubr.bf16.gmra.mrb[4].mxu0 %v3812_v35  ;;  %v3827_v44 = vld [vmem:[#allocation2 + $0x1b0] ss:$52 sps:$4 sm:$0xff]  }
 0x1a3   : > { %2985 = vmatpush1.bf16.msra.mxu0 %v1682_v50  ;;  %2921 = vmatprep.mubr.bf16.mxu0 %v3816_v61 }
 0x1a4   : > { %2589 = vmatmul.mubr.bf16.gmra.mrb[8].mxu1 %v3815_v54  ;;  %v506_v54 = vrot.slane %v4061_v18, %v4112_v10 }
 0x1a5   : > { %3470 = vmatpush1.bf16.msra.mxu1 %v4549_v1  ;;  %2598 = vmatprep.mubr.bf16.mxu1 %v3819_v52  ;;  %v3829_v1 = vld [vmem:[#allocation2 + $0x21c] ss:$52 sps:$4 sm:$0xff]   ;;  %v4792_v52 = vrot.slane %v4065_v20, %v4112_v10 }
 0x1a6   : > { %3455 = vmatprep.subr.bf16.mxu1 %v4554_v31  ;;  %v3828_v31 = vld [vmem:[#allocation2 + $0x30] ss:$52 sps:$4 sm:$0xff]   ;;  %v4788_v50 = vrot.slane %v506_v54, %v4112_v10 }
 0x1a9   : > { %3471 = vmatpush1.bf16.msra.mxu1 %v4566_v59  ;;  %v3831_v59 = vld [vmem:[#allocation2 + $0x218] ss:$52 sps:$4 sm:$0xff]  }
 0x1aa   : > { %3456 = vmatprep.subr.bf16.mxu1 %v4569_v51  ;;  %2922 = vmatmul.mubr.bf16.gmra.mrb[8].mxu0 %v3818_v3  ;;  %v3833_v51 = vld [vmem:[#allocation2 + $0x284] ss:$52 sps:$4 sm:$0xff]   ;;  %v481_v3 = vpop.permute.xlu1 %480 }
 0x1ab   : > { %2931 = vmatprep.mubr.bf16.mxu0 %v3822_v34  ;;  %v522_v18 = vsub.f32 %v481_v3, %v4792_v52 }
 0x1ac   : > { %2599 = vmatmul.mubr.bf16.gmra.mrb[12].mxu1 %v3821_v7 }
 0x1ad   : > { %3472 = vmatpush1.bf16.msra.mxu1 %v4581_v14  ;;  %2608 = vmatprep.mubr.bf16.mxu1 %v3825_v11  ;;  %v1784_v14 = vld [vmem:[#allocation2 + $0x2e8] sm:$0xff]  ;;  %v486_v11 = vpop.permute.xlu0 %485  ;;  %v532_v10 = vand.u32 2147483647, %v522_v18 }
 0x1ae   : > { %3457 = vmatprep.subr.bf16.mxu1 %v4585_v63  ;;  %v3832_v63 = vld [vmem:[#allocation2 + $0x98] ss:$52 sps:$4 sm:$0xff]  }
 0x1b1   : > { %3473 = vmatpush1.bf16.msra.mxu1 %v4594_v16  ;;  %v3835_v16 = vld [vmem:[#allocation2 + $0x280] ss:$52 sps:$4 sm:$0xff]  }
 0x1b2   : > { %3458 = vmatprep.subr.bf16.mxu1 %v4599_v19  ;;  %2932 = vmatmul.mubr.bf16.gmra.mrb[12].mxu0 %v3824_v41  ;;  %v3430_v19 = vcombine.high %v1784_v14, %v1784_v14 }
 0x1b3   : > { %3012 = vmatprep.mubr.bf16.mxu0 %v3914_v0 }
 0x1b4   : > { %2609 = vmatmul.mubr.bf16.gmra.mrb[16].mxu1 %v3827_v44  ;;  %v521_v44 = vsub.f32 %v481_v3, %v4788_v50 }
 0x1b5   : > { %3474 = vmatpush1.bf16.msra.mxu1 %v4608_v30  ;;  %2618 = vmatprep.mubr.bf16.mxu1 %v3829_v1  ;;  %v3836_v30 = vld [vmem:[#allocation2 + $0x100] ss:$52 sps:$4 sm:$0xff]  }
 0x1b6   : > { %3459 = vmatprep.subr.bf16.mxu1 %v4611_v40  ;;  %v3429_v40 = vcombine.low %v1784_v14, %v1784_v14  ;;  %v531_v20 = vand.u32 2147483647, %v521_v44  ;;  %v491_v14 = vpop.permute.xlu1 %490 }
 0x1b9   : > { %3475 = vmatpush1.bf16.msra.mxu1 %v4620_v42  ;;  %v3842_v42 = vld [vmem:[#allocation2 + $0x1cc] ss:$52 sps:$4 sm:$0xff]  }
 0x1ba   : > { %3460 = vmatprep.subr.bf16.mxu1 %v4624_v58  ;;  %3438 = vmatmul.mubr.msk.bf16.vlgmr.msra.gmra.mrb[0].mxu0 %vm2289_vm0, %v3828_v31  ;;  %v3839_v58 = vld [vmem:[#allocation2 + $0x168] ss:$52 sps:$4 sm:$0xff]   ;;  %v523_v31 = vsub.f32 %v486_v11, %v4788_v50 }
 0x1bb   : > { %3022 = vmatprep.mubr.bf16.mxu0 %v3914_v0 }
 0x1bc   : > { %2619 = vmatmul.mubr.bf16.gmra.mrb[20].mxu1 %v3831_v59  ;;  %v524_v59 = vsub.f32 %v486_v11, %v4792_v52 }
 0x1bd   : > { %3476 = vmatpush1.bf16.msra.mxu1 %v4633_v5  ;;  %2628 = vmatprep.mubr.bf16.mxu1 %v3833_v51  ;;  %v3840_v5 = vld [vmem:[#allocation2 + $0x1c8] ss:$52 sps:$4 sm:$0xff]  }
 0x1be   : > { %3461 = vmatprep.subr.bf16.mxu1 %v4637_v17  ;;  %v3844_v17 = vld [vmem:[#allocation2 + $0x234] ss:$52 sps:$4 sm:$0xff]  }
 0x1c1   : > { %3477 = vmatpush1.bf16.msra.mxu1 %v4645_v24  ;;  %v3843_v24 = vld [vmem:[#allocation2 + $0x1d0] ss:$52 sps:$4 sm:$0xff]  }
 0x1c2   : > { %3462 = vmatprep.subr.bf16.mxu1 %v4650_v28  ;;  %3439 = vmatmul.mubr.msk.bf16.gmra.mrb[4].mxu0 %vm2289_vm0, %v3832_v63  ;;  %v3846_v28 = vld [vmem:[#allocation2 + $0x230] ss:$52 sps:$4 sm:$0xff]   ;;  %v533_v63 = vand.u32 2147483647, %v523_v31 }
 0x1c3   : > { %3032 = vmatprep.mubr.bf16.mxu0 %v3914_v0 }
 0x1c4   : > { %2629 = vmatmul.mubr.bf16.gmra.mrb[24].mxu1 %v3835_v16  ;;  %v534_v16 = vand.u32 2147483647, %v524_v59 }
 0x1c5   : > { %3478 = vmatpush1.bf16.msra.mxu1 %v4658_v36  ;;  %2638 = vmatprep.mubr.bf16.mxu1 %v3430_v19  ;;  %v1787_v36 = vld [vmem:[#allocation2 + $0x300] sm:$0xff] }
 0x1c6   : > { %3463 = vmatprep.subr.bf16.mxu1 %v4662_v55  ;;  %v3436_v55 = vcombine.high %v1787_v36, %v1787_v36  ;;  %v3435_v33 = vcombine.low %v1787_v36, %v1787_v36  ;;  %v526_v36 = vsub.f32 %v491_v14, %v4792_v52 }
 0x1c9   : > { %3479 = vmatpush1.bf16.msra.mxu1 %v4671_v2 }
 0x1ca   : > { %3464 = vmatprep.subr.bf16.mxu1 %v4674_v43  ;;  %3440 = vmatmul.mubr.msk.bf16.gmra.mrb[8].mxu0 %vm2289_vm0, %v3836_v30 }
 0x1cb   : > { %3042 = vmatprep.mubr.bf16.mxu0 %v3914_v0 }
 0x1cc   : > { %2639 = vmatmul.mubr.bf16.gmra.mrb[28].mxu1 %v3429_v40 }
 0x1cd   : > { %3480 = vmatpush1.bf16.msra.mxu1 %v4680_v39  ;;  %2941 = vmatprep.mubr.bf16.mxu1 %v3842_v42 }
 0x1ce   : > { %3465 = vmatprep.subr.bf16.mxu1 %v4684_v26 }
 0x1d1   : > { %3481 = vmatpush1.bf16.msra.mxu1 %v4691_v15 }
 0x1d2   : > { %3441 = vmatmul.mubr.msk.bf16.gmra.mrb[12].mxu0 %vm2289_vm0, %v3839_v58  ;;  %v541_v58 = vsub.f32 1.0, %v531_v20 }
 0x1d3   : > { %3052 = vmatprep.mubr.bf16.mxu0 %v3914_v0 }
 0x1d4   : > { %2942 = vmatmul.mubr.bf16.vlgmr.msra.gmra.mrb[32].mxu1 %v3840_v5  ;;  %v542_v5 = vsub.f32 1.0, %v532_v10 }
 0x1d5   : > { %2951 = vmatprep.mubr.bf16.mxu1 %v3844_v17  ;;  %v496_v17 = vpop.permute.xlu0 %495 }
 0x1da   : > { %3442 = vmatmul.mubr.msk.bf16.gmra.mrb[32].mxu0 %vm2289_vm0, %v3843_v24 }
 0x1db   : > { %3062 = vmatprep.mubr.bf16.mxu0 %v3914_v0 }
 0x1dc   : > { %2952 = vmatmul.mubr.bf16.gmra.mrb[36].mxu1 %v3846_v28 }
 0x1dd   : > { %2961 = vmatprep.mubr.bf16.mxu1 %v3848_v12  ;;  %v525_v12 = vsub.f32 %v491_v14, %v4788_v50 }
 0x1e2   : > { %3443 = vmatmul.mubr.msk.bf16.gmra.mrb[36].mxu0 %vm2289_vm0, %v3847_v48 }
 0x1e3   : > { %3072 = vmatprep.mubr.bf16.mxu0 %v3914_v0 }
 0x1e4   : > { %2962 = vmatmul.mubr.bf16.gmra.mrb[40].mxu1 %v3850_v13  ;;  %v543_v13 = vsub.f32 1.0, %v533_v63 }
 0x1e5   : > { %2971 = vmatprep.mubr.bf16.mxu1 %v3436_v55  ;;  %v544_v55 = vsub.f32 1.0, %v534_v16 }
 0x1e6   : > { %v4822_v44 = vmax.f32 %v543_v13, 0.0 }
 0x1ea   : > { %3444 = vmatmul.mubr.msk.bf16.gmra.mrb[40].mxu0 %vm2289_vm0, %v3851_v60  ;;  %v527_v60 = vsub.f32 %v496_v17, %v4788_v50 }
 0x1eb   : > { %3082 = vmatprep.mubr.bf16.mxu0 %v3914_v0 }
 0x1ec   : > { %2972 = vmatmul.mubr.bf16.gmra.mrb[44].mxu1 %v3435_v33  ;;  %v4817_v33 = vmax.f32 %v541_v58, 0.0  ;;  %v537_v10 = vand.u32 2147483647, %v527_v60 }
 0x1ee   : > { %v547_v13 = vsub.f32 1.0, %v537_v10 }
 0x1f2   : > { %3445 = vmatmul.mubr.msk.bf16.gmra.mrb[44].mxu0 %vm2289_vm0, %v3854_v38  ;;  %v4819_v38 = vmax.f32 %v542_v5, 0.0 }
 0x24d   : > { %v2832_v62 = vpop.f32.mrb[16].mxu0 }
 0x24e   : > { %v2834_v57 = vpop.f32.mrb[17].mxu0 }
 0x24f   : > { %v2836_v2 = vpop.f32.mrb[18].mxu0 }
 0x250   : > { %v2838_v43 = vpop.f32.mrb[19].mxu0 }
 0x255   : > { %v4747_v23 = vpop.f32.mrb[20].mxu0 }
 0x256   : > { %v4749_v29 = vpop.f32.mrb[21].mxu0 }
 0x257   : > { %v4751_v6 = vpop.f32.mrb[22].mxu0 }
 0x258   : > { %v4753_v4 = vpop.f32.mrb[23].mxu0 }
 0x25d   : > { %v4755_v9 = vpop.f32.mrb[24].mxu0 }
 0x25e   : > { %v4757_v39 = vpop.f32.mrb[25].mxu0 }
 0x25f   : > { %v4759_v0 = vpop.f32.mrb[26].mxu0 }
 0x260   : > { %v4761_v8 = vpop.f32.mrb[27].mxu0 }
 0x265   : > { %v4763_v26 = vpop.f32.mrb[28].mxu0 }
 0x266   : > { %v4765_v22 = vpop.f32.mrb[29].mxu0 }
 0x267   : > { %v2570_v27 = vpop.f32.mrb[0].mxu1  ;;  %v2866_v15 = vpop.f32.mrb[30].mxu0 }
 0x268   : > { %v2572_v25 = vpop.f32.mrb[1].mxu1  ;;  %v2867_v21 = vpop.f32.mrb[31].mxu0  ;;  %v535_v15 = vand.u32 2147483647, %v525_v12 }
 0x269   : > { %v2574_v45 = vpop.f32.mrb[2].mxu1  ;;  %v536_v21 = vand.u32 2147483647, %v526_v36 }
 0x26a   : > { %v4767_v47 = vpop.f32.mrb[3].mxu1  ;;  %v545_v5 = vsub.f32 1.0, %v535_v15 }
 0x26f   : > { %v4769_v37 = vpop.f32.mrb[4].mxu1 }
 0x270   : > { %v4771_v32 = vpop.f32.mrb[5].mxu1 }
 0x271   : > { %v4773_v46 = vpop.f32.mrb[6].mxu1 }
 0x272   : > { %v4775_v49 = vpop.f32.mrb[7].mxu1 }
 0x277   : > { %v4777_v56 = vpop.f32.mrb[8].mxu1 }
 0x278   : > { %v4779_v53 = vpop.f32.mrb[9].mxu1 }
 0x279   : > { %v4781_v35 = vpop.f32.mrb[10].mxu1 }
 0x27a   : > { %v4785_v61 = vpop.f32.mrb[11].mxu1 }
 0x27f   : > { %v4794_v7 = vpop.f32.mrb[12].mxu1 }
 0x280   : > { %v4796_v34 = vpop.f32.mrb[13].mxu1 }
 0x281   : > { %v4798_v41 = vpop.f32.mrb[14].mxu1 }
 0x282   : > { %v4802_v1 = vpop.f32.mrb[15].mxu1 }
 0x287   : > { %v2610_v51 = vpop.f32.mrb[16].mxu1 }
 0x288   : > { %v4806_v19 = vadd.f32 %v2832_v62, %v2610_v51  ;;  %v2612_v30 = vpop.f32.mrb[17].mxu1  ;;  %v501_v62 = vpop.permute.xlu1 %500 }
 0x289   : > { %v4808_v40 = vadd.f32 %v2834_v57, %v2612_v30  ;;  %v2614_v42 = vpop.f32.mrb[18].mxu1  ;;  %v528_v57 = vsub.f32 %v496_v17, %v4792_v52  ;;  %v529_v17 = vsub.f32 %v501_v62, %v4788_v50  ;;  %v530_v12 = vsub.f32 %v501_v62, %v4792_v52 }
 0x28a   : > { %v4810_v24 = vadd.f32 %v2836_v2, %v2614_v42  ;;  %v2616_v28 = vpop.f32.mrb[19].mxu1 }
 0x28b   : > { %v4814_v48 = vadd.f32 %v2838_v43, %v2616_v28  ;;  %v4824_v43 = vmax.f32 %v544_v55, 0.0  ;;  %v538_v30 = vand.u32 2147483647, %v528_v57  ;;  %v4845_v57 = vmax.f32 %v545_v5, 0.0 }
 0x28d   : > { %v3014_v2 = vpop.f32.mrb[0].mxu0 }
 0x28e   : > { %v3482_v54 = vadd.f32 %v3014_v2, %v2570_v27  ;;  %v3016_v3 = vpop.f32.mrb[1].mxu0  ;;  %v539_v2 = vand.u32 2147483647, %v529_v17 }
 0x28f   : > { %v2620_v11 = vpop.f32.mrb[20].mxu1  ;;  %v3483_v18 = vadd.f32 %v3016_v3, %v2572_v25  ;;  %v3018_v31 = vpop.f32.mrb[2].mxu0 }
 0x290   : > { %v4827_v59 = vadd.f32 %v4747_v23, %v2620_v11  ;;  %v2622_v20 = vpop.f32.mrb[21].mxu1  ;;  %v3091_v51 = vmul.f32 %v3482_v54, %v4817_v33  ;;  %v3484_v14 = vadd.f32 %v3018_v31, %v2574_v45  ;;  %v3020_v63 = vpop.f32.mrb[3].mxu0 }
 0x291   : > { %v4831_v16 = vadd.f32 %v4749_v29, %v2622_v20  ;;  %v2624_v27 = vpop.f32.mrb[22].mxu1  ;;  %v3092_v42 = vmul.f32 %v3483_v18, %v4819_v38  ;;  %v3485_v58 = vadd.f32 %v3020_v63, %v4767_v47  ;;  %v546_v29 = vsub.f32 1.0, %v536_v21 }
 0x292   : > { %v4836_v25 = vadd.f32 %v4751_v6, %v2624_v27  ;;  %v2626_v23 = vpop.f32.mrb[23].mxu1  ;;  %v3093_v28 = vmul.f32 %v3484_v14, %v4822_v44  ;;  %v548_v47 = vsub.f32 1.0, %v538_v30  ;;  %v4854_v18 = vmax.f32 %v547_v13, 0.0 }
 0x293   : > { %v4841_v45 = vadd.f32 %v4753_v4, %v2626_v23  ;;  %v3094_v36 = vmul.f32 %v3485_v58, %v4824_v43  ;;  %v4848_v3 = vmax.f32 %v546_v29, 0.0  ;;  %v540_v4 = vand.u32 2147483647, %v530_v12 }
 0x294   : > { %v3121_v55 = vadd.f32 %v3093_v28, %v3091_v51  ;;  %v4861_v14 = vmax.f32 %v548_v47, 0.0  ;;  %v549_v30 = vsub.f32 1.0, %v539_v2 }
 0x295   : > { %v3131_v60 = vadd.f32 %v3094_v36, %v3092_v42  ;;  %v3024_v6 = vpop.f32.mrb[4].mxu0 }
 0x296   : > { %v3486_v50 = vadd.f32 %v3024_v6, %v4769_v37  ;;  %v3026_v15 = vpop.f32.mrb[5].mxu0  ;;  %v4873_v12 = vmax.f32 %v549_v30, 0.0 }
 0x297   : > { %v2630_v54 = vpop.f32.mrb[24].mxu1  ;;  %v3487_v21 = vadd.f32 %v3026_v15, %v4771_v32  ;;  %v3028_v52 = vpop.f32.mrb[6].mxu0 }
 0x298   : > { %v4852_v62 = vadd.f32 %v4755_v9, %v2630_v54  ;;  %v2632_v11 = vpop.f32.mrb[25].mxu1  ;;  %v3095_v31 = vmul.f32 %v3486_v50, %v4845_v57  ;;  %v3488_v20 = vadd.f32 %v3028_v52, %v4773_v46  ;;  %v3030_v10 = vpop.f32.mrb[7].mxu0 }
 0x299   : > { %v4859_v37 = vadd.f32 %v4757_v39, %v2632_v11  ;;  %v2634_v51 = vpop.f32.mrb[26].mxu1  ;;  %v3096_v32 = vmul.f32 %v3487_v21, %v4848_v3  ;;  %v3489_v63 = vadd.f32 %v3030_v10, %v4775_v49  ;;  %v550_v39 = vsub.f32 1.0, %v540_v4 }
 0x29a   : > { %v4866_v9 = vadd.f32 %v4759_v0, %v2634_v51  ;;  %v2636_v27 = vpop.f32.mrb[27].mxu1  ;;  %v3122_v42 = vadd.f32 %v3121_v55, %v3095_v31  ;;  %v3097_v58 = vmul.f32 %v3488_v20, %v4854_v18 }
 0x29b   : > { %v4870_v46 = vadd.f32 %v4761_v8, %v2636_v27  ;;  %v3132_v23 = vadd.f32 %v3131_v60, %v3096_v32  ;;  %v3098_v5 = vmul.f32 %v3489_v63, %v4861_v14  ;;  %v4876_v13 = vmax.f32 %v550_v39, 0.0 }
 0x29c   : > { %v3123_v17 = vadd.f32 %v3122_v42, %v3097_v58 }
 0x29d   : > { %v3133_v28 = vadd.f32 %v3132_v23, %v3098_v5  ;;  %v3034_v29 = vpop.f32.mrb[8].mxu0 }
 0x29e   : > { %v3490_v0 = vadd.f32 %v3034_v29, %v4777_v56  ;;  %v3036_v49 = vpop.f32.mrb[9].mxu0 }
 0x29f   : > { %v2640_v36 = vpop.f32.mrb[28].mxu1  ;;  %v3491_v55 = vadd.f32 %v3036_v49, %v4779_v53  ;;  %v3038_v47 = vpop.f32.mrb[10].mxu0 }
 0x2a0   : > { %v4880_v8 = vadd.f32 %v4763_v26, %v2640_v36  ;;  %v2642_v60 = vpop.f32.mrb[29].mxu1  ;;  %v3099_v6 = vmul.f32 %v3490_v0, %v4873_v12  ;;  %v3492_v2 = vadd.f32 %v3038_v47, %v4781_v35  ;;  %v3040_v50 = vpop.f32.mrb[11].mxu0 }
 0x2a1   : > { %v4885_v15 = vadd.f32 %v4765_v22, %v2642_v60  ;;  %v2644_v56 = vpop.f32.mrb[30].mxu1  ;;  %v3100_v54 = vmul.f32 %v3491_v55, %v4876_v13  ;;  %v3493_v4 = vadd.f32 %v3040_v50, %v4785_v61 }
 0x2a2   : > { %v2645_v21 = vpop.f32.mrb[31].mxu1  ;;  %v3124_v53 = vadd.f32 %v3123_v17, %v3099_v6  ;;  %v3101_v52 = vmul.f32 %v3492_v2, %v4817_v33 }
 0x2a3   : > { %v3134_v26 = vadd.f32 %v3133_v28, %v3100_v54  ;;  %v3102_v11 = vmul.f32 %v3493_v4, %v4819_v38 }
 0x2a4   : > { %v3125_v31 = vrot.slane %v3124_v53, 4 }
 0x2a5   : > { %v3135_v20 = vrot.slane %v3134_v26, 4  ;;  %v3044_v10 = vpop.f32.mrb[12].mxu0 }
 0x2a6   : > { %v3126_v35 = vadd.f32 %v3125_v31, %v3124_v53  ;;  %v3494_v51 = vadd.f32 %v3044_v10, %v4794_v7  ;;  %v3046_v22 = vpop.f32.mrb[13].mxu0 }
 0x2a7   : > { %v2943_v32 = vpop.f32.mrb[32].mxu1  ;;  %v3136_v63 = vadd.f32 %v3135_v20, %v3134_v26  ;;  %v3495_v27 = vadd.f32 %v3046_v22, %v4796_v34  ;;  %v3048_v30 = vpop.f32.mrb[14].mxu0 }
 0x2a8   : > { %v3499_v61 = vadd.f32 %v4806_v19, %v2943_v32  ;;  %v2945_v42 = vpop.f32.mrb[33].mxu1  ;;  %v3127_v58 = vrot.slane %v3126_v35, 2  ;;  %v3103_v39 = vmul.f32 %v3494_v51, %v4822_v44  ;;  %v3496_v23 = vadd.f32 %v3048_v30, %v4798_v41  ;;  %v3050_v5 = vpop.f32.mrb[15].mxu0 }
 0x2a9   : > { %v3502_v17 = vadd.f32 %v4808_v40, %v2945_v42  ;;  %v2947_v28 = vpop.f32.mrb[34].mxu1  ;;  %v3137_v29 = vrot.slane %v3136_v63, 2  ;;  %v3104_v7 = vmul.f32 %v3495_v27, %v4824_v43  ;;  %v3497_v0 = vadd.f32 %v3050_v5, %v4802_v1 }
 0x2aa   : > { %v3505_v34 = vadd.f32 %v4810_v24, %v2947_v28  ;;  %v2949_v49 = vpop.f32.mrb[35].mxu1  ;;  %v3128_v36 = vadd.f32 %v3127_v58, %v3126_v35  ;;  %v3141_v19 = vadd.f32 %v3103_v39, %v3101_v52  ;;  %v3105_v55 = vmul.f32 %v3496_v23, %v4845_v57 }
 0x2ab   : > { %v3508_v47 = vadd.f32 %v4814_v48, %v2949_v49  ;;  %v3138_v60 = vadd.f32 %v3137_v29, %v3136_v63  ;;  %v3151_v41 = vadd.f32 %v3104_v7, %v3102_v11  ;;  %v3106_v6 = vmul.f32 %v3497_v0, %v4848_v3 }
 0x2ac   : > { %v3129_v40 = vrot.slane %v3128_v36, 1  ;;  %v3142_v2 = vadd.f32 %v3141_v19, %v3105_v55 }
 0x2ad   : > { %v3139_v50 = vrot.slane %v3138_v60, 1  ;;  %v3152_v56 = vadd.f32 %v3151_v41, %v3106_v6  ;;  %v3054_v54 = vpop.f32.mrb[32].mxu0 }
 0x2ae   : > { %v4903_v4 = vadd.f32 %v3129_v40, %v3128_v36  ;;  %v3500_v1 = vadd.f32 %v3499_v61, %v3054_v54  ;;  %v3056_v24 = vpop.f32.mrb[33].mxu0 }
 0x2af   : > { %v2953_v21 = vpop.f32.mrb[36].mxu1  ;;  %v4905_v53 = vadd.f32 %v3139_v50, %v3138_v60  ;;  %v3503_v52 = vadd.f32 %v3502_v17, %v3056_v24  ;;  %v3058_v26 = vpop.f32.mrb[34].mxu0 }
 0x2b0   : > { %v3511_v48 = vadd.f32 %v4827_v59, %v2953_v21  ;;  %v2955_v31 = vpop.f32.mrb[37].mxu1  ;;  %v3107_v11 = vmul.f32 %v3500_v1, %v4854_v18  ;;  %v3506_v20 = vadd.f32 %v3505_v34, %v3058_v26  ;;  %v3060_v10 = vpop.f32.mrb[35].mxu0 }
 0x2b1   : > { %v3514_v35 = vadd.f32 %v4831_v16, %v2955_v31  ;;  %v2957_v51 = vpop.f32.mrb[38].mxu1  ;;  %v3187_v22 = vcombine.low %v4903_v4, %v4905_v53  ;;  %v3108_v32 = vmul.f32 %v3503_v52, %v4861_v14  ;;  %v3509_v63 = vadd.f32 %v3508_v47, %v3060_v10 }
 0x2b2   : > { %v3517_v27 = vadd.f32 %v4836_v25, %v2957_v51  ;;  %v2959_v30 = vpop.f32.mrb[39].mxu1  ;;  %v3143_v61 = vadd.f32 %v3142_v2, %v3107_v11  ;;  %v3109_v59 = vmul.f32 %v3506_v20, %v4873_v12 }
 0x2b3   : > { %v3520_v42 = vadd.f32 %v4841_v45, %v2959_v30  ;;  %v3153_v58 = vadd.f32 %v3152_v56, %v3108_v32  ;;  %v3110_v39 = vmul.f32 %v3509_v63, %v4876_v13 }
 0x2b4   : > { %v3144_v23 = vadd.f32 %v3143_v61, %v3109_v59 }
 0x2b5   : > { %v3154_v16 = vadd.f32 %v3153_v58, %v3110_v39  ;;  %v3064_v5 = vpop.f32.mrb[36].mxu0 }
 0x2b6   : > { %v3145_v17 = vrot.slane %v3144_v23, 4  ;;  %v3512_v28 = vadd.f32 %v3511_v48, %v3064_v5  ;;  %v3066_v29 = vpop.f32.mrb[37].mxu0 }
 0x2b7   : > { %v2963_v7 = vpop.f32.mrb[40].mxu1  ;;  %v3155_v0 = vrot.slane %v3154_v16, 4  ;;  %v3515_v34 = vadd.f32 %v3514_v35, %v3066_v29  ;;  %v3068_v49 = vpop.f32.mrb[38].mxu0 }
 0x2b8   : > { %v3523_v25 = vadd.f32 %v4852_v62, %v2963_v7  ;;  %v2965_v36 = vpop.f32.mrb[41].mxu1  ;;  %v3146_v19 = vadd.f32 %v3145_v17, %v3144_v23  ;;  %v3111_v55 = vmul.f32 %v3512_v28, %v4817_v33  ;;  %v3518_v45 = vadd.f32 %v3517_v27, %v3068_v49  ;;  %v3070_v47 = vpop.f32.mrb[39].mxu0 }
 0x2b9   : > { %v3526_v60 = vadd.f32 %v4859_v37, %v2965_v36  ;;  %v2967_v41 = vpop.f32.mrb[42].mxu1  ;;  %v3156_v6 = vadd.f32 %v3155_v0, %v3154_v16  ;;  %v3112_v40 = vmul.f32 %v3515_v34, %v4819_v38  ;;  %v3521_v2 = vadd.f32 %v3520_v42, %v3070_v47 }
 0x2ba   : > { %v3529_v50 = vadd.f32 %v4866_v9, %v2967_v41  ;;  %v2969_v56 = vpop.f32.mrb[43].mxu1  ;;  %v3147_v54 = vrot.slane %v3146_v19, 2  ;;  %v3113_v1 = vmul.f32 %v3518_v45, %v4822_v44 }
 0x2bb   : > { %v3532_v62 = vadd.f32 %v4870_v46, %v2969_v56  ;;  %v3157_v24 = vrot.slane %v3156_v6, 2  ;;  %v3114_v33 = vmul.f32 %v3521_v2, %v4824_v43 }
 0x2bc   : > { %v3148_v21 = vadd.f32 %v3147_v54, %v3146_v19  ;;  %v3161_v52 = vadd.f32 %v3113_v1, %v3111_v55 }
 0x2bd   : > { %v3158_v26 = vadd.f32 %v3157_v24, %v3156_v6  ;;  %v3171_v37 = vadd.f32 %v3114_v33, %v3112_v40  ;;  %v3074_v48 = vpop.f32.mrb[40].mxu0 }
 0x2be   : > { %v3149_v31 = vrot.slane %v3148_v21, 1  ;;  %v3524_v11 = vadd.f32 %v3523_v25, %v3074_v48  ;;  %v3076_v38 = vpop.f32.mrb[41].mxu0 }
 0x2bf   : > { %v2973_v20 = vpop.f32.mrb[44].mxu1  ;;  %v3159_v10 = vrot.slane %v3158_v26, 1  ;;  %v3527_v9 = vadd.f32 %v3526_v60, %v3076_v38  ;;  %v3078_v35 = vpop.f32.mrb[42].mxu0 }
 0x2c0   : > { %v3535_v51 = vadd.f32 %v4880_v8, %v2973_v20  ;;  %v2975_v44 = vpop.f32.mrb[45].mxu1  ;;  %v3150_v32 = vadd.f32 %v3149_v31, %v3148_v21  ;;  %v3115_v46 = vmul.f32 %v3524_v11, %v4845_v57  ;;  %v3530_v63 = vadd.f32 %v3529_v50, %v3078_v35  ;;  %v3080_v43 = vpop.f32.mrb[43].mxu0 }
 0x2c1   : > { %v3538_v27 = vadd.f32 %v4885_v15, %v2975_v44  ;;  %v2977_v30 = vpop.f32.mrb[46].mxu1  ;;  %v3160_v61 = vadd.f32 %v3159_v10, %v3158_v26  ;;  %v3116_v59 = vmul.f32 %v3527_v9, %v4848_v3  ;;  %v3533_v42 = vadd.f32 %v3532_v62, %v3080_v43 }
 0x2c2   : > { %v2978_v58 = vpop.f32.mrb[47].mxu1  ;;  %v3162_v39 = vadd.f32 %v3161_v52, %v3115_v46  ;;  %v3117_v23 = vmul.f32 %v3530_v63, %v4854_v18 }
 0x2c3   : > { %v3188_v16 = vcombine.low %v3150_v32, %v3160_v61  ;;  %v3172_v5 = vadd.f32 %v3171_v37, %v3116_v59  ;;  %v3118_v8 = vmul.f32 %v3533_v42, %v4861_v14 }
 0x2c4   : > { %v3163_v17 = vadd.f32 %v3162_v39, %v3117_v23 }
 0x2c5   : > { %v3190_v57 = vrot.slane %v3188_v16, 7  ;;  %v3173_v28 = vadd.f32 %v3172_v5, %v3118_v8  ;;  %v3084_v29 = vpop.f32.mrb[44].mxu0 }
 0x2c6   : > { %v3536_v15 = vadd.f32 %v3535_v51, %v3084_v29  ;;  %v3086_v7 = vpop.f32.mrb[45].mxu0 }
 0x2c7   : > { %v3192_v3 = vsel %vm3191_vm1, %v3190_v57, %v3187_v22  ;;  %v3539_v0 = vadd.f32 %v3538_v27, %v3086_v7  ;;  %v3088_v34 = vpop.f32.mrb[46].mxu0 }
 0x2c8   : > { %v3194_v49 = vsel %vm3193_vm2, %v3190_v57, %v3192_v3  ;;  %v3119_v18 = vmul.f32 %v3536_v15, %v4873_v12  ;;  %v3089_v25 = vpop.f32.mrb[47].mxu0 }
 0x2c9   : > { %v3120_v14 = vmul.f32 %v3539_v0, %v4876_v13 }
 0x2ca   : > { %v3164_v36 = vadd.f32 %v3163_v17, %v3119_v18 }
 0x2cb   : > { %v3174_v19 = vadd.f32 %v3173_v28, %v3120_v14 }
 0x2cc   : > { %v3165_v55 = vrot.slane %v3164_v36, 4 }
 0x2cd   : > { %v3175_v45 = vrot.slane %v3174_v19, 4 }
 0x2ce   : > { %v3166_v47 = vadd.f32 %v3165_v55, %v3164_v36 }
 0x2cf   : > { %v3176_v60 = vadd.f32 %v3175_v45, %v3174_v19 }
 0x2d0   : > { %v3167_v41 = vrot.slane %v3166_v47, 2 }
 0x2d1   : > { %v3177_v6 = vrot.slane %v3176_v60, 2 }
 0x2d2   : > { %v3168_v40 = vadd.f32 %v3167_v41, %v3166_v47 }
 0x2d3   : > { %v3178_v4 = vadd.f32 %v3177_v6, %v3176_v60 }
 0x2d4   : > { %v3169_v53 = vrot.slane %v3168_v40, 1 }
 0x2d5   : > { %v3179_v22 = vrot.slane %v3178_v4, 1 }
 0x2d6   : > { %v3170_v2 = vadd.f32 %v3169_v53, %v3168_v40 }
 0x2d7   : > { %v3180_v50 = vadd.f32 %v3179_v22, %v3178_v4 }
 0x2d9   : > { %v3189_v56 = vcombine.low %v3170_v2, %v3180_v50 }
 0x2db   : > { %v3195_v12 = vrot.slane %v3189_v56, 6 }
 0x2dd   : > { %v3197_v13 = vsel %vm3196_vm3, %v3195_v12, %v3194_v49 }
 0x2de   : > { %v3199_v54 = vsel %vm3198_vm4, %v3195_v12, %v3197_v13 }
 0x2df   : > { %3201 = vst [vmem:[%s277_s12] sm:$0x77] %v3199_v54 }
 0x2e0 PF: > { %s16_s20 = sadd.s32 1, %s3909_s20   ;;  %s4964_s18 = smov %s3905_s19 }
 0x2e1   : > { %p13_p4 = scmp.ge.s32.totalorder %s16_s20, 4   ;;  %s4965_s19 = smov %s4967_s22 }
 0x2e3   :  { %15 = sbr.rel (!%p13_p4) target bundleno = 2 (0x2), region = 75 }
 0x2ea   :  { %3232 = vsyncpa [#allocation3], 1 }
 0x2eb   :  { %3234 = vsyncpa [#allocation3 + $0x1], 1 }

</bundles_post_ra>
